<compile_context>
chip_gen: v5e
topology: v5e:2x2
jax: 0.10.0
libtpu: 0.0.40
codegen_flags: <defaults>
</compile_context>

<pallas_src>
import functools

import jax
import jax.numpy as jnp
import numpy as np
from jax.experimental import pallas as pl
from jax.experimental.pallas import tpu as pltpu

_EPS = 1e-5


# ---------------------------------------------------------------------------
# Kernel helpers
# ---------------------------------------------------------------------------
def _gather_tap(src_ref, dy, dx, hh, ww, stride):
    """(hh, ww, C) window of a padded (Hp, Wp, C) scratch starting at (dy, dx),
    subsampled by `stride` along the two spatial dims (lanes = C untouched)."""
    if stride == 1:
        return src_ref[dy:dy + hh, dx:dx + ww, :]
    return src_ref[pl.ds(dy, hh, stride), pl.ds(dx, ww, stride), :]


def _zero_border(ref, hh, ww, c):
    """Zero only the 1-pixel border of a (hh+2, ww+2, c) padded scratch.

    The interior is fully overwritten every grid step, so re-zeroing the whole
    scratch (previous version) was redundant store-slot work.
    """
    dt = ref.dtype
    row = jnp.zeros((1, ww + 2, c), dt)
    ref[0:1, :, :] = row
    ref[hh + 1:hh + 2, :, :] = row
    col = jnp.zeros((hh + 2, 1, c), dt)
    ref[:, 0:1, :] = col
    ref[:, ww + 1:ww + 2, :] = col


# ---------------------------------------------------------------------------
# Fused BasicBlock kernel (one grid step == one batch image)
# ---------------------------------------------------------------------------
def _basic_block_kernel(*refs, stride, has_shortcut, H, W, Cin, Cout):
    if has_shortcut:
        (x_ref, w1_ref, b1_ref, w2_ref, b2_ref, wsc_ref, bsc_ref,
         o_ref, xpad_ref, p2_ref, slab1_ref, slab2_ref) = refs
    else:
        (x_ref, w1_ref, b1_ref, w2_ref, b2_ref,
         o_ref, xpad_ref, p2_ref, slab1_ref, slab2_ref) = refs
        wsc_ref = bsc_ref = None

    H1, W1 = H // stride, W // stride
    M1 = H1 * W1
    cdt = slab1_ref.dtype                     # bf16 matmul operand dtype

    # ---- conv1 (+ folded bn1 scale): pad -> im2col slab -> one K=9*Cin matmul
    _zero_border(xpad_ref, H, W, Cin)
    xpad_ref[1:H + 1, 1:W + 1, :] = x_ref[0].astype(xpad_ref.dtype)

    for dy in range(3):
        for dx in range(3):
            t = dy * 3 + dx
            piece = _gather_tap(xpad_ref, dy, dx, H1, W1, stride)   # (H1,W1,Cin)
            slab1_ref[:, t * Cin:(t + 1) * Cin] = (
                piece.reshape(M1, Cin).astype(cdt))

    acc1 = jnp.dot(slab1_ref[...], w1_ref[...],
                   preferred_element_type=jnp.float32)               # (M1, Cout)
    out1 = jnp.maximum(acc1 + b1_ref[...], 0.0)                      # f32

    # ---- shortcut -----------------------------------------------------------
    if has_shortcut:
        # 1x1 stride-s conv samples x[i*s, j*s, :] == padded centre tap.
        xs = _gather_tap(xpad_ref, 1, 1, H1, W1, stride)
        xs = xs.reshape(M1, Cin).astype(cdt)
        res = jnp.dot(xs, wsc_ref[...],
                      preferred_element_type=jnp.float32) + bsc_ref[...]
    else:
        # identity shortcut (stride == 1 and Cin == Cout)
        res = x_ref[0].reshape(H * W, Cin)                           # f32

    # ---- conv2 (+ folded bn2 scale), stride 1 ------------------------------
    _zero_border(p2_ref, H1, W1, Cout)
    p2_ref[1:H1 + 1, 1:W1 + 1, :] = out1.reshape(H1, W1, Cout)

    for dy in range(3):
        for dx in range(3):
            t = dy * 3 + dx
            piece = _gather_tap(p2_ref, dy, dx, H1, W1, 1)           # (H1,W1,Cout)
            slab2_ref[:, t * Cout:(t + 1) * Cout] = (
                piece.reshape(M1, Cout).astype(cdt))

    acc2 = jnp.dot(slab2_ref[...], w2_ref[...],
                   preferred_element_type=jnp.float32)               # (M1, Cout)
    out2 = jnp.maximum(acc2 + b2_ref[...] + res, 0.0)                # f32

    # Lane-dense NCHW store: (M1, Cout) -> (Cout, M1), lanes = H1*W1.
    o_ref[0] = jnp.transpose(out2, (1, 0)).astype(o_ref.dtype)


# ---------------------------------------------------------------------------
# Wrapper
# ---------------------------------------------------------------------------
def fold_bn(gamma, beta, mean, var, eps=_EPS):
    scale = gamma / jnp.sqrt(var + eps)
    bias = beta - mean * scale
    return scale.astype(jnp.float32), bias.astype(jnp.float32)


def _vmem_limit_bytes():
    # ~3/4 of physical VMEM, capped at 100 MiB: ~96 MiB on v5e/v6e (128 MiB
    # physical), ~48 MiB on v7x (64 MiB physical). Falls back to a safe value.
    try:
        phys = int(pltpu.get_tpu_info().vmem_capacity_bytes)
        return min((phys * 3) // 4, 100 * 1024 * 1024)
    except Exception:
        return 32 * 1024 * 1024


def basic_block_pallas(x_nchw, p, stride, in_planes, planes,
                       compute_dtype=jnp.bfloat16):
    N, Cin, H, W = x_nchw.shape
    assert Cin == in_planes
    assert stride in (1, 2) and H % stride == 0 and W % stride == 0
    Cout = planes
    H1, W1 = H // stride, W // stride
    M1 = H1 * W1
    has_shortcut = (stride != 1) or (in_planes != planes)

    x = jnp.transpose(x_nchw, (0, 2, 3, 1)).astype(jnp.float32)      # NCHW->NHWC

    # Fold BN (eval-mode running stats) scale into the conv weights; cast the
    # matmul operands to bf16 (bias / residual / ReLU epilogue stays f32).
    s1, b1 = fold_bn(p["g1"], p["be1"], p["m1"], p["v1"])
    s2, b2 = fold_bn(p["g2"], p["be2"], p["m2"], p["v2"])
    w1 = (p["w1"] * s1).reshape(9 * Cin, Cout).astype(compute_dtype)  # im2col W
    w2 = (p["w2"] * s2).reshape(9 * Cout, Cout).astype(compute_dtype)
    b1 = b1.reshape(1, Cout)
    b2 = b2.reshape(1, Cout)

    operands = [x, w1, b1, w2, b2]
    in_specs = [
        pl.BlockSpec((1, H, W, Cin), lambda n: (n, 0, 0, 0)),
        pl.BlockSpec((9 * Cin, Cout), lambda n: (0, 0)),
        pl.BlockSpec((1, Cout), lambda n: (0, 0)),
        pl.BlockSpec((9 * Cout, Cout), lambda n: (0, 0)),
        pl.BlockSpec((1, Cout), lambda n: (0, 0)),
    ]
    flops_per_img = 2 * M1 * (9 * Cin * Cout + 9 * Cout * Cout)
    if has_shortcut:
        ssc, bsc = fold_bn(p["gsc"], p["besc"], p["msc"], p["vsc"])
        wsc = (p["wsc"].reshape(Cin, Cout) * ssc).astype(compute_dtype)
        operands += [wsc, bsc.reshape(1, Cout)]
        in_specs += [
            pl.BlockSpec((Cin, Cout), lambda n: (0, 0)),
            pl.BlockSpec((1, Cout), lambda n: (0, 0)),
        ]
        flops_per_img += 2 * M1 * Cin * Cout

    kernel = functools.partial(
        _basic_block_kernel, stride=stride, has_shortcut=has_shortcut,
        H=H, W=W, Cin=Cin, Cout=Cout)

    weight_bytes = sum(int(o.size) * o.dtype.itemsize for o in operands[1:])
    cost = pl.CostEstimate(
        flops=int(N * flops_per_img),
        transcendentals=0,
        bytes_accessed=int(x.size) * 4 + N * Cout * M1 * 4 + weight_bytes)

    out = pl.pallas_call(
        kernel,
        out_shape=jax.ShapeDtypeStruct((N, Cout, M1), jnp.float32),
        grid_spec=pltpu.PrefetchScalarGridSpec(
            num_scalar_prefetch=0,
            grid=(N,),
            in_specs=in_specs,
            out_specs=pl.BlockSpec((1, Cout, M1), lambda n: (n, 0, 0)),
            scratch_shapes=[
                pltpu.VMEM((H + 2, W + 2, Cin), jnp.float32),      # padded conv1 in
                pltpu.VMEM((H1 + 2, W1 + 2, Cout), jnp.float32),   # padded conv2 in
                pltpu.VMEM((M1, 9 * Cin), compute_dtype),          # conv1 im2col slab
                pltpu.VMEM((M1, 9 * Cout), compute_dtype),         # conv2 im2col slab
            ],
        ),
        compiler_params=pltpu.CompilerParams(
            dimension_semantics=("parallel",),
            vmem_limit_bytes=_vmem_limit_bytes(),
        ),
        cost_estimate=cost,
    )(*operands)

    return out.reshape(N, Cout, H1, W1)                              # NCHW


# ---------------------------------------------------------------------------
# Pure-JAX reference (eval-mode BN, f32), for correctness checking
# ---------------------------------------------------------------------------
def basic_block_reference(x_nchw, p, stride, in_planes, planes, eps=_EPS):
    x = jnp.transpose(x_nchw, (0, 2, 3, 1)).astype(jnp.float32)

    def conv(a, w, s, pad):
        return jax.lax.conv_general_dilated(
            a, w, (s, s), [(pad, pad), (pad, pad)],
            dimension_numbers=("NHWC", "HWIO", "NHWC"))

    def bn(a, g, b, m, v):
        return (a - m) / jnp.sqrt(v + eps) * g + b

    out = jax.nn.relu(bn(conv(x, p["w1"], stride, 1),
                         p["g1"], p["be1"], p["m1"], p["v1"]))
    out = bn(conv(out, p["w2"], 1, 1), p["g2"], p["be2"], p["m2"], p["v2"])
    if stride != 1 or in_planes != planes:
        sc = bn(conv(x, p["wsc"], stride, 0),
                p["gsc"], p["besc"], p["msc"], p["vsc"])
    else:
        sc = x
    out = jax.nn.relu(out + sc)
    return jnp.transpose(out, (0, 3, 1, 2))


# ---------------------------------------------------------------------------
# Main
# ---------------------------------------------------------------------------
def _bn_params(key, c):
    k1, k2, k3, k4 = jax.random.split(key, 4)
    return (1.0 + 0.1 * jax.random.normal(k1, (c,), jnp.float32),
            0.1 * jax.random.normal(k2, (c,), jnp.float32),
            0.1 * jax.random.normal(k3, (c,), jnp.float32),
            1.0 + 0.1 * jnp.abs(jax.random.normal(k4, (c,), jnp.float32)))


def _make_params(key, cin, cout, with_shortcut):
    ks = jax.random.split(key, 6)
    g1, be1, m1, v1 = _bn_params(ks[1], cout)
    g2, be2, m2, v2 = _bn_params(ks[3], cout)
    params = dict(
        w1=0.2 * jax.random.normal(ks[0], (3, 3, cin, cout), jnp.float32),
        g1=g1, be1=be1, m1=m1, v1=v1,
        w2=0.2 * jax.random.normal(ks[2], (3, 3, cout, cout), jnp.float32),
        g2=g2, be2=be2, m2=m2, v2=v2,
    )
    if with_shortcut:
        gsc, besc, msc, vsc = _bn_params(ks[5], cout)
        params.update(
            wsc=0.2 * jax.random.normal(ks[4], (1, 1, cin, cout), jnp.float32),
            gsc=gsc, besc=besc, msc=msc, vsc=vsc)
    return params


if __name__ == "__main__":
    key = jax.random.PRNGKey(0)
    kx1, kp1, kx2, kp2 = jax.random.split(key, 4)

    # bf16 MXU operands (per the perf review) -> compare against the f32
    # reference with a bf16-appropriate tolerance.
    TOL = dict(rtol=3e-2, atol=3e-2)

    # Case 1: stride-2 downsampling block with 1x1-conv + BN shortcut.
    N, cin, cout, hs, stride = 2, 4, 8, 16, 2
    params = _make_params(kp1, cin, cout, True)
    x = jax.random.normal(kx1, (N, cin, hs, hs), jnp.float32)        # NCHW
    out = jax.block_until_ready(basic_block_pallas(x, params, stride, cin, cout))
    ref = jax.block_until_ready(basic_block_reference(x, params, stride, cin, cout))
    np.testing.assert_allclose(np.asarray(out), np.asarray(ref), **TOL)

    # Case 2: stride-1 block with identity shortcut.
    cin2 = cout2 = 8
    params2 = _make_params(kp2, cin2, cout2, False)
    x2 = jax.random.normal(kx2, (N, cin2, hs, hs), jnp.float32)
    out2 = jax.block_until_ready(basic_block_pallas(x2, params2, 1, cin2, cout2))
    ref2 = jax.block_until_ready(basic_block_reference(x2, params2, 1, cin2, cout2))
    np.testing.assert_allclose(np.asarray(out2), np.asarray(ref2), **TOL)

    print("KERNEL_OK")
</pallas_src>

<mosaic_0001>
module attributes {stable_mosaic.version = 11 : i64} {
  func.func @_basic_block_kernel(%arg0: i32, %arg1: memref<1x16x16x4xf32, #tpu.memory_space<vmem>>, %arg2: memref<36x8xbf16, #tpu.memory_space<vmem>>, %arg3: memref<1x8xf32, #tpu.memory_space<vmem>>, %arg4: memref<72x8xbf16, #tpu.memory_space<vmem>>, %arg5: memref<1x8xf32, #tpu.memory_space<vmem>>, %arg6: memref<4x8xbf16, #tpu.memory_space<vmem>>, %arg7: memref<1x8xf32, #tpu.memory_space<vmem>>, %arg8: memref<1x8x64xf32, #tpu.memory_space<vmem>>, %arg9: memref<18x18x4xf32, #tpu.memory_space<vmem>>, %arg10: memref<10x10x8xf32, #tpu.memory_space<vmem>>, %arg11: memref<64x36xbf16, #tpu.memory_space<vmem>>, %arg12: memref<64x72xbf16, #tpu.memory_space<vmem>>) attributes {dimension_semantics = [#tpu.dimension_semantics<parallel>], iteration_bounds = array<i64: 2>, scalar_prefetch = 0 : i64, scratch_operands = 4 : i64, tpu.core_type = #tpu.core_type<tc>, window_params = [{transform_indices = @transform_0, window_bounds = array<i64: 1, 16, 16, 4>}, {pipeline_mode = #tpu.pipeline_mode<synchronous>, transform_indices = @transform_1, window_bounds = array<i64: 36, 8>}, {pipeline_mode = #tpu.pipeline_mode<synchronous>, transform_indices = @transform_2, window_bounds = array<i64: 1, 8>}, {pipeline_mode = #tpu.pipeline_mode<synchronous>, transform_indices = @transform_3, window_bounds = array<i64: 72, 8>}, {pipeline_mode = #tpu.pipeline_mode<synchronous>, transform_indices = @transform_4, window_bounds = array<i64: 1, 8>}, {pipeline_mode = #tpu.pipeline_mode<synchronous>, transform_indices = @transform_5, window_bounds = array<i64: 4, 8>}, {pipeline_mode = #tpu.pipeline_mode<synchronous>, transform_indices = @transform_6, window_bounds = array<i64: 1, 8>}, {transform_indices = @transform_7, window_bounds = array<i64: 1, 8, 64>}]} {
    %cst = arith.constant 0.000000e+00 : f32
    %0 = vector.broadcast %cst : f32 to vector<1x18x4xf32>
    %c0 = arith.constant 0 : index
    %c0_0 = arith.constant 0 : index
    %c0_1 = arith.constant 0 : index
    %1 = vector.load %arg9[%c0, %c0_0, %c0_1] : memref<18x18x4xf32, #tpu.memory_space<vmem>>, vector<1x18x4xf32>
    tpu.vector_store %arg9[%c0, %c0_0, %c0_1], %0 {strides = array<i32>} : memref<18x18x4xf32, #tpu.memory_space<vmem>>, vector<1x18x4xf32>,
    %c17 = arith.constant 17 : index
    %c0_2 = arith.constant 0 : index
    %c0_3 = arith.constant 0 : index
    %2 = vector.load %arg9[%c17, %c0_2, %c0_3] : memref<18x18x4xf32, #tpu.memory_space<vmem>>, vector<1x18x4xf32>
    tpu.vector_store %arg9[%c17, %c0_2, %c0_3], %0 {strides = array<i32>} : memref<18x18x4xf32, #tpu.memory_space<vmem>>, vector<1x18x4xf32>,
    %cst_4 = arith.constant 0.000000e+00 : f32
    %3 = vector.broadcast %cst_4 : f32 to vector<18x1x4xf32>
    %c0_5 = arith.constant 0 : index
    %c0_6 = arith.constant 0 : index
    %c0_7 = arith.constant 0 : index
    %4 = vector.load %arg9[%c0_5, %c0_6, %c0_7] : memref<18x18x4xf32, #tpu.memory_space<vmem>>, vector<18x1x4xf32>
    tpu.vector_store %arg9[%c0_5, %c0_6, %c0_7], %3 {strides = array<i32>} : memref<18x18x4xf32, #tpu.memory_space<vmem>>, vector<18x1x4xf32>,
    %c0_8 = arith.constant 0 : index
    %c17_9 = arith.constant 17 : index
    %c0_10 = arith.constant 0 : index
    %5 = vector.load %arg9[%c0_8, %c17_9, %c0_10] : memref<18x18x4xf32, #tpu.memory_space<vmem>>, vector<18x1x4xf32>
    tpu.vector_store %arg9[%c0_8, %c17_9, %c0_10], %3 {strides = array<i32>} : memref<18x18x4xf32, #tpu.memory_space<vmem>>, vector<18x1x4xf32>,
    %c0_11 = arith.constant 0 : index
    %c0_12 = arith.constant 0 : index
    %c0_13 = arith.constant 0 : index
    %c0_14 = arith.constant 0 : index
    %6 = vector.load %arg1[%c0_11, %c0_12, %c0_13, %c0_14] : memref<1x16x16x4xf32, #tpu.memory_space<vmem>>, vector<1x16x16x4xf32>
    %7 = vector.shape_cast %6 : vector<1x16x16x4xf32> to vector<16x16x4xf32>
    %c1 = arith.constant 1 : index
    %c1_15 = arith.constant 1 : index
    %c0_16 = arith.constant 0 : index
    %8 = vector.load %arg9[%c1, %c1_15, %c0_16] : memref<18x18x4xf32, #tpu.memory_space<vmem>>, vector<16x16x4xf32>
    tpu.vector_store %arg9[%c1, %c1_15, %c0_16], %7 {strides = array<i32>} : memref<18x18x4xf32, #tpu.memory_space<vmem>>, vector<16x16x4xf32>,
    %c0_17 = arith.constant 0 : index
    %c0_18 = arith.constant 0 : index
    %c0_19 = arith.constant 0 : index
    %9 = tpu.strided_load %arg9[%c0_17, %c0_18, %c0_19] {strides = array<i32: 2, 2, 1>} : memref<18x18x4xf32, #tpu.memory_space<vmem>>, vector<8x8x4xf32>
    %10 = vector.shape_cast %9 : vector<8x8x4xf32> to vector<64x4xf32>
    %11 = arith.truncf %10 : vector<64x4xf32> to vector<64x4xbf16>
    %c0_20 = arith.constant 0 : index
    %c0_21 = arith.constant 0 : index
    %12 = vector.load %arg11[%c0_20, %c0_21] : memref<64x36xbf16, #tpu.memory_space<vmem>>, vector<64x4xbf16>
    tpu.vector_store %arg11[%c0_20, %c0_21], %11 {strides = array<i32>} : memref<64x36xbf16, #tpu.memory_space<vmem>>, vector<64x4xbf16>,
    %c0_22 = arith.constant 0 : index
    %c1_23 = arith.constant 1 : index
    %c0_24 = arith.constant 0 : index
    %13 = tpu.strided_load %arg9[%c0_22, %c1_23, %c0_24] {strides = array<i32: 2, 2, 1>} : memref<18x18x4xf32, #tpu.memory_space<vmem>>, vector<8x8x4xf32>
    %14 = vector.shape_cast %13 : vector<8x8x4xf32> to vector<64x4xf32>
    %15 = arith.truncf %14 : vector<64x4xf32> to vector<64x4xbf16>
    %c0_25 = arith.constant 0 : index
    %c4 = arith.constant 4 : index
    %16 = vector.load %arg11[%c0_25, %c4] : memref<64x36xbf16, #tpu.memory_space<vmem>>, vector<64x4xbf16>
    tpu.vector_store %arg11[%c0_25, %c4], %15 {strides = array<i32>} : memref<64x36xbf16, #tpu.memory_space<vmem>>, vector<64x4xbf16>,
    %c0_26 = arith.constant 0 : index
    %c2 = arith.constant 2 : index
    %c0_27 = arith.constant 0 : index
    %17 = tpu.strided_load %arg9[%c0_26, %c2, %c0_27] {strides = array<i32: 2, 2, 1>} : memref<18x18x4xf32, #tpu.memory_space<vmem>>, vector<8x8x4xf32>
    %18 = vector.shape_cast %17 : vector<8x8x4xf32> to vector<64x4xf32>
    %19 = arith.truncf %18 : vector<64x4xf32> to vector<64x4xbf16>
    %c0_28 = arith.constant 0 : index
    %c8 = arith.constant 8 : index
    %20 = vector.load %arg11[%c0_28, %c8] : memref<64x36xbf16, #tpu.memory_space<vmem>>, vector<64x4xbf16>
    tpu.vector_store %arg11[%c0_28, %c8], %19 {strides = array<i32>} : memref<64x36xbf16, #tpu.memory_space<vmem>>, vector<64x4xbf16>,
    %c1_29 = arith.constant 1 : index
    %c0_30 = arith.constant 0 : index
    %c0_31 = arith.constant 0 : index
    %21 = tpu.strided_load %arg9[%c1_29, %c0_30, %c0_31] {strides = array<i32: 2, 2, 1>} : memref<18x18x4xf32, #tpu.memory_space<vmem>>, vector<8x8x4xf32>
    %22 = vector.shape_cast %21 : vector<8x8x4xf32> to vector<64x4xf32>
    %23 = arith.truncf %22 : vector<64x4xf32> to vector<64x4xbf16>
    %c0_32 = arith.constant 0 : index
    %c12 = arith.constant 12 : index
    %24 = vector.load %arg11[%c0_32, %c12] : memref<64x36xbf16, #tpu.memory_space<vmem>>, vector<64x4xbf16>
    tpu.vector_store %arg11[%c0_32, %c12], %23 {strides = array<i32>} : memref<64x36xbf16, #tpu.memory_space<vmem>>, vector<64x4xbf16>,
    %c1_33 = arith.constant 1 : index
    %c1_34 = arith.constant 1 : index
    %c0_35 = arith.constant 0 : index
    %25 = tpu.strided_load %arg9[%c1_33, %c1_34, %c0_35] {strides = array<i32: 2, 2, 1>} : memref<18x18x4xf32, #tpu.memory_space<vmem>>, vector<8x8x4xf32>
    %26 = vector.shape_cast %25 : vector<8x8x4xf32> to vector<64x4xf32>
    %27 = arith.truncf %26 : vector<64x4xf32> to vector<64x4xbf16>
    %c0_36 = arith.constant 0 : index
    %c16 = arith.constant 16 : index
    %28 = vector.load %arg11[%c0_36, %c16] : memref<64x36xbf16, #tpu.memory_space<vmem>>, vector<64x4xbf16>
    tpu.vector_store %arg11[%c0_36, %c16], %27 {strides = array<i32>} : memref<64x36xbf16, #tpu.memory_space<vmem>>, vector<64x4xbf16>,
    %c1_37 = arith.constant 1 : index
    %c2_38 = arith.constant 2 : index
    %c0_39 = arith.constant 0 : index
    %29 = tpu.strided_load %arg9[%c1_37, %c2_38, %c0_39] {strides = array<i32: 2, 2, 1>} : memref<18x18x4xf32, #tpu.memory_space<vmem>>, vector<8x8x4xf32>
    %30 = vector.shape_cast %29 : vector<8x8x4xf32> to vector<64x4xf32>
    %31 = arith.truncf %30 : vector<64x4xf32> to vector<64x4xbf16>
    %c0_40 = arith.constant 0 : index
    %c20 = arith.constant 20 : index
    %32 = vector.load %arg11[%c0_40, %c20] : memref<64x36xbf16, #tpu.memory_space<vmem>>, vector<64x4xbf16>
    tpu.vector_store %arg11[%c0_40, %c20], %31 {strides = array<i32>} : memref<64x36xbf16, #tpu.memory_space<vmem>>, vector<64x4xbf16>,
    %c2_41 = arith.constant 2 : index
    %c0_42 = arith.constant 0 : index
    %c0_43 = arith.constant 0 : index
    %33 = tpu.strided_load %arg9[%c2_41, %c0_42, %c0_43] {strides = array<i32: 2, 2, 1>} : memref<18x18x4xf32, #tpu.memory_space<vmem>>, vector<8x8x4xf32>
    %34 = vector.shape_cast %33 : vector<8x8x4xf32> to vector<64x4xf32>
    %35 = arith.truncf %34 : vector<64x4xf32> to vector<64x4xbf16>
    %c0_44 = arith.constant 0 : index
    %c24 = arith.constant 24 : index
    %36 = vector.load %arg11[%c0_44, %c24] : memref<64x36xbf16, #tpu.memory_space<vmem>>, vector<64x4xbf16>
    tpu.vector_store %arg11[%c0_44, %c24], %35 {strides = array<i32>} : memref<64x36xbf16, #tpu.memory_space<vmem>>, vector<64x4xbf16>,
    %c2_45 = arith.constant 2 : index
    %c1_46 = arith.constant 1 : index
    %c0_47 = arith.constant 0 : index
    %37 = tpu.strided_load %arg9[%c2_45, %c1_46, %c0_47] {strides = array<i32: 2, 2, 1>} : memref<18x18x4xf32, #tpu.memory_space<vmem>>, vector<8x8x4xf32>
    %38 = vector.shape_cast %37 : vector<8x8x4xf32> to vector<64x4xf32>
    %39 = arith.truncf %38 : vector<64x4xf32> to vector<64x4xbf16>
    %c0_48 = arith.constant 0 : index
    %c28 = arith.constant 28 : index
    %40 = vector.load %arg11[%c0_48, %c28] : memref<64x36xbf16, #tpu.memory_space<vmem>>, vector<64x4xbf16>
    tpu.vector_store %arg11[%c0_48, %c28], %39 {strides = array<i32>} : memref<64x36xbf16, #tpu.memory_space<vmem>>, vector<64x4xbf16>,
    %c2_49 = arith.constant 2 : index
    %c2_50 = arith.constant 2 : index
    %c0_51 = arith.constant 0 : index
    %41 = tpu.strided_load %arg9[%c2_49, %c2_50, %c0_51] {strides = array<i32: 2, 2, 1>} : memref<18x18x4xf32, #tpu.memory_space<vmem>>, vector<8x8x4xf32>
    %42 = vector.shape_cast %41 : vector<8x8x4xf32> to vector<64x4xf32>
    %43 = arith.truncf %42 : vector<64x4xf32> to vector<64x4xbf16>
    %c0_52 = arith.constant 0 : index
    %c32 = arith.constant 32 : index
    %44 = vector.load %arg11[%c0_52, %c32] : memref<64x36xbf16, #tpu.memory_space<vmem>>, vector<64x4xbf16>
    tpu.vector_store %arg11[%c0_52, %c32], %43 {strides = array<i32>} : memref<64x36xbf16, #tpu.memory_space<vmem>>, vector<64x4xbf16>,
    %c0_53 = arith.constant 0 : index
    %c0_54 = arith.constant 0 : index
    %45 = vector.load %arg11[%c0_53, %c0_54] : memref<64x36xbf16, #tpu.memory_space<vmem>>, vector<64x36xbf16>
    %c0_55 = arith.constant 0 : index
    %c0_56 = arith.constant 0 : index
    %46 = vector.load %arg2[%c0_55, %c0_56] : memref<36x8xbf16, #tpu.memory_space<vmem>>, vector<36x8xbf16>
    %cst_57 = arith.constant dense<0.000000e+00> : vector<64x8xf32>
    %47 = tpu.matmul %45, %46, %cst_57 {dimension_numbers = #tpu.dot_dimension_numbers<[1], [0], [0], [1], [0, 0, 1, 1], [], []>} : vector<64x36xbf16>, vector<36x8xbf16>, vector<64x8xf32> -> vector<64x8xf32>
    %c0_58 = arith.constant 0 : index
    %c0_59 = arith.constant 0 : index
    %48 = vector.load %arg3[%c0_58, %c0_59] : memref<1x8xf32, #tpu.memory_space<vmem>>, vector<1x8xf32>
    %49 = vector.broadcast %48 : vector<1x8xf32> to vector<64x8xf32>
    %50 = arith.addf %47, %49 : vector<64x8xf32>
    %cst_60 = arith.constant 0.000000e+00 : f32
    %51 = vector.broadcast %cst_60 : f32 to vector<64x8xf32>
    %52 = arith.maximumf %50, %51 : vector<64x8xf32>
    %c1_61 = arith.constant 1 : index
    %c1_62 = arith.constant 1 : index
    %c0_63 = arith.constant 0 : index
    %53 = tpu.strided_load %arg9[%c1_61, %c1_62, %c0_63] {strides = array<i32: 2, 2, 1>} : memref<18x18x4xf32, #tpu.memory_space<vmem>>, vector<8x8x4xf32>
    %54 = vector.shape_cast %53 : vector<8x8x4xf32> to vector<64x4xf32>
    %55 = arith.truncf %54 : vector<64x4xf32> to vector<64x4xbf16>
    %c0_64 = arith.constant 0 : index
    %c0_65 = arith.constant 0 : index
    %56 = vector.load %arg6[%c0_64, %c0_65] : memref<4x8xbf16, #tpu.memory_space<vmem>>, vector<4x8xbf16>
    %cst_66 = arith.constant dense<0.000000e+00> : vector<64x8xf32>
    %57 = tpu.matmul %55, %56, %cst_66 {dimension_numbers = #tpu.dot_dimension_numbers<[1], [0], [0], [1], [0, 0, 1, 1], [], []>} : vector<64x4xbf16>, vector<4x8xbf16>, vector<64x8xf32> -> vector<64x8xf32>
    %c0_67 = arith.constant 0 : index
    %c0_68 = arith.constant 0 : index
    %58 = vector.load %arg7[%c0_67, %c0_68] : memref<1x8xf32, #tpu.memory_space<vmem>>, vector<1x8xf32>
    %59 = vector.broadcast %58 : vector<1x8xf32> to vector<64x8xf32>
    %60 = arith.addf %57, %59 : vector<64x8xf32>
    %cst_69 = arith.constant 0.000000e+00 : f32
    %61 = vector.broadcast %cst_69 : f32 to vector<1x10x8xf32>
    %c0_70 = arith.constant 0 : index
    %c0_71 = arith.constant 0 : index
    %c0_72 = arith.constant 0 : index
    %62 = vector.load %arg10[%c0_70, %c0_71, %c0_72] : memref<10x10x8xf32, #tpu.memory_space<vmem>>, vector<1x10x8xf32>
    tpu.vector_store %arg10[%c0_70, %c0_71, %c0_72], %61 {strides = array<i32>} : memref<10x10x8xf32, #tpu.memory_space<vmem>>, vector<1x10x8xf32>,
    %c9 = arith.constant 9 : index
    %c0_73 = arith.constant 0 : index
    %c0_74 = arith.constant 0 : index
    %63 = vector.load %arg10[%c9, %c0_73, %c0_74] : memref<10x10x8xf32, #tpu.memory_space<vmem>>, vector<1x10x8xf32>
    tpu.vector_store %arg10[%c9, %c0_73, %c0_74], %61 {strides = array<i32>} : memref<10x10x8xf32, #tpu.memory_space<vmem>>, vector<1x10x8xf32>,
    %cst_75 = arith.constant 0.000000e+00 : f32
    %64 = vector.broadcast %cst_75 : f32 to vector<10x1x8xf32>
    %c0_76 = arith.constant 0 : index
    %c0_77 = arith.constant 0 : index
    %c0_78 = arith.constant 0 : index
    %65 = vector.load %arg10[%c0_76, %c0_77, %c0_78] : memref<10x10x8xf32, #tpu.memory_space<vmem>>, vector<10x1x8xf32>
    tpu.vector_store %arg10[%c0_76, %c0_77, %c0_78], %64 {strides = array<i32>} : memref<10x10x8xf32, #tpu.memory_space<vmem>>, vector<10x1x8xf32>,
    %c0_79 = arith.constant 0 : index
    %c9_80 = arith.constant 9 : index
    %c0_81 = arith.constant 0 : index
    %66 = vector.load %arg10[%c0_79, %c9_80, %c0_81] : memref<10x10x8xf32, #tpu.memory_space<vmem>>, vector<10x1x8xf32>
    tpu.vector_store %arg10[%c0_79, %c9_80, %c0_81], %64 {strides = array<i32>} : memref<10x10x8xf32, #tpu.memory_space<vmem>>, vector<10x1x8xf32>,
    %67 = vector.shape_cast %52 : vector<64x8xf32> to vector<8x8x8xf32>
    %c1_82 = arith.constant 1 : index
    %c1_83 = arith.constant 1 : index
    %c0_84 = arith.constant 0 : index
    %68 = vector.load %arg10[%c1_82, %c1_83, %c0_84] : memref<10x10x8xf32, #tpu.memory_space<vmem>>, vector<8x8x8xf32>
    tpu.vector_store %arg10[%c1_82, %c1_83, %c0_84], %67 {strides = array<i32>} : memref<10x10x8xf32, #tpu.memory_space<vmem>>, vector<8x8x8xf32>,
    %c0_85 = arith.constant 0 : index
    %c0_86 = arith.constant 0 : index
    %c0_87 = arith.constant 0 : index
    %69 = vector.load %arg10[%c0_85, %c0_86, %c0_87] : memref<10x10x8xf32, #tpu.memory_space<vmem>>, vector<8x8x8xf32>
    %70 = vector.shape_cast %69 : vector<8x8x8xf32> to vector<64x8xf32>
    %71 = arith.truncf %70 : vector<64x8xf32> to vector<64x8xbf16>
    %c0_88 = arith.constant 0 : index
    %c0_89 = arith.constant 0 : index
    %72 = vector.load %arg12[%c0_88, %c0_89] : memref<64x72xbf16, #tpu.memory_space<vmem>>, vector<64x8xbf16>
    tpu.vector_store %arg12[%c0_88, %c0_89], %71 {strides = array<i32>} : memref<64x72xbf16, #tpu.memory_space<vmem>>, vector<64x8xbf16>,
    %c0_90 = arith.constant 0 : index
    %c1_91 = arith.constant 1 : index
    %c0_92 = arith.constant 0 : index
    %73 = vector.load %arg10[%c0_90, %c1_91, %c0_92] : memref<10x10x8xf32, #tpu.memory_space<vmem>>, vector<8x8x8xf32>
    %74 = vector.shape_cast %73 : vector<8x8x8xf32> to vector<64x8xf32>
    %75 = arith.truncf %74 : vector<64x8xf32> to vector<64x8xbf16>
    %c0_93 = arith.constant 0 : index
    %c8_94 = arith.constant 8 : index
    %76 = vector.load %arg12[%c0_93, %c8_94] : memref<64x72xbf16, #tpu.memory_space<vmem>>, vector<64x8xbf16>
    tpu.vector_store %arg12[%c0_93, %c8_94], %75 {strides = array<i32>} : memref<64x72xbf16, #tpu.memory_space<vmem>>, vector<64x8xbf16>,
    %c0_95 = arith.constant 0 : index
    %c2_96 = arith.constant 2 : index
    %c0_97 = arith.constant 0 : index
    %77 = vector.load %arg10[%c0_95, %c2_96, %c0_97] : memref<10x10x8xf32, #tpu.memory_space<vmem>>, vector<8x8x8xf32>
    %78 = vector.shape_cast %77 : vector<8x8x8xf32> to vector<64x8xf32>
    %79 = arith.truncf %78 : vector<64x8xf32> to vector<64x8xbf16>
    %c0_98 = arith.constant 0 : index
    %c16_99 = arith.constant 16 : index
    %80 = vector.load %arg12[%c0_98, %c16_99] : memref<64x72xbf16, #tpu.memory_space<vmem>>, vector<64x8xbf16>
    tpu.vector_store %arg12[%c0_98, %c16_99], %79 {strides = array<i32>} : memref<64x72xbf16, #tpu.memory_space<vmem>>, vector<64x8xbf16>,
    %c1_100 = arith.constant 1 : index
    %c0_101 = arith.constant 0 : index
    %c0_102 = arith.constant 0 : index
    %81 = vector.load %arg10[%c1_100, %c0_101, %c0_102] : memref<10x10x8xf32, #tpu.memory_space<vmem>>, vector<8x8x8xf32>
    %82 = vector.shape_cast %81 : vector<8x8x8xf32> to vector<64x8xf32>
    %83 = arith.truncf %82 : vector<64x8xf32> to vector<64x8xbf16>
    %c0_103 = arith.constant 0 : index
    %c24_104 = arith.constant 24 : index
    %84 = vector.load %arg12[%c0_103, %c24_104] : memref<64x72xbf16, #tpu.memory_space<vmem>>, vector<64x8xbf16>
    tpu.vector_store %arg12[%c0_103, %c24_104], %83 {strides = array<i32>} : memref<64x72xbf16, #tpu.memory_space<vmem>>, vector<64x8xbf16>,
    %c1_105 = arith.constant 1 : index
    %c1_106 = arith.constant 1 : index
    %c0_107 = arith.constant 0 : index
    %85 = vector.load %arg10[%c1_105, %c1_106, %c0_107] : memref<10x10x8xf32, #tpu.memory_space<vmem>>, vector<8x8x8xf32>
    %86 = vector.shape_cast %85 : vector<8x8x8xf32> to vector<64x8xf32>
    %87 = arith.truncf %86 : vector<64x8xf32> to vector<64x8xbf16>
    %c0_108 = arith.constant 0 : index
    %c32_109 = arith.constant 32 : index
    %88 = vector.load %arg12[%c0_108, %c32_109] : memref<64x72xbf16, #tpu.memory_space<vmem>>, vector<64x8xbf16>
    tpu.vector_store %arg12[%c0_108, %c32_109], %87 {strides = array<i32>} : memref<64x72xbf16, #tpu.memory_space<vmem>>, vector<64x8xbf16>,
    %c1_110 = arith.constant 1 : index
    %c2_111 = arith.constant 2 : index
    %c0_112 = arith.constant 0 : index
    %89 = vector.load %arg10[%c1_110, %c2_111, %c0_112] : memref<10x10x8xf32, #tpu.memory_space<vmem>>, vector<8x8x8xf32>
    %90 = vector.shape_cast %89 : vector<8x8x8xf32> to vector<64x8xf32>
    %91 = arith.truncf %90 : vector<64x8xf32> to vector<64x8xbf16>
    %c0_113 = arith.constant 0 : index
    %c40 = arith.constant 40 : index
    %92 = vector.load %arg12[%c0_113, %c40] : memref<64x72xbf16, #tpu.memory_space<vmem>>, vector<64x8xbf16>
    tpu.vector_store %arg12[%c0_113, %c40], %91 {strides = array<i32>} : memref<64x72xbf16, #tpu.memory_space<vmem>>, vector<64x8xbf16>,
    %c2_114 = arith.constant 2 : index
    %c0_115 = arith.constant 0 : index
    %c0_116 = arith.constant 0 : index
    %93 = vector.load %arg10[%c2_114, %c0_115, %c0_116] : memref<10x10x8xf32, #tpu.memory_space<vmem>>, vector<8x8x8xf32>
    %94 = vector.shape_cast %93 : vector<8x8x8xf32> to vector<64x8xf32>
    %95 = arith.truncf %94 : vector<64x8xf32> to vector<64x8xbf16>
    %c0_117 = arith.constant 0 : index
    %c48 = arith.constant 48 : index
    %96 = vector.load %arg12[%c0_117, %c48] : memref<64x72xbf16, #tpu.memory_space<vmem>>, vector<64x8xbf16>
    tpu.vector_store %arg12[%c0_117, %c48], %95 {strides = array<i32>} : memref<64x72xbf16, #tpu.memory_space<vmem>>, vector<64x8xbf16>,
    %c2_118 = arith.constant 2 : index
    %c1_119 = arith.constant 1 : index
    %c0_120 = arith.constant 0 : index
    %97 = vector.load %arg10[%c2_118, %c1_119, %c0_120] : memref<10x10x8xf32, #tpu.memory_space<vmem>>, vector<8x8x8xf32>
    %98 = vector.shape_cast %97 : vector<8x8x8xf32> to vector<64x8xf32>
    %99 = arith.truncf %98 : vector<64x8xf32> to vector<64x8xbf16>
    %c0_121 = arith.constant 0 : index
    %c56 = arith.constant 56 : index
    %100 = vector.load %arg12[%c0_121, %c56] : memref<64x72xbf16, #tpu.memory_space<vmem>>, vector<64x8xbf16>
    tpu.vector_store %arg12[%c0_121, %c56], %99 {strides = array<i32>} : memref<64x72xbf16, #tpu.memory_space<vmem>>, vector<64x8xbf16>,
    %c2_122 = arith.constant 2 : index
    %c2_123 = arith.constant 2 : index
    %c0_124 = arith.constant 0 : index
    %101 = vector.load %arg10[%c2_122, %c2_123, %c0_124] : memref<10x10x8xf32, #tpu.memory_space<vmem>>, vector<8x8x8xf32>
    %102 = vector.shape_cast %101 : vector<8x8x8xf32> to vector<64x8xf32>
    %103 = arith.truncf %102 : vector<64x8xf32> to vector<64x8xbf16>
    %c0_125 = arith.constant 0 : index
    %c64 = arith.constant 64 : index
    %104 = vector.load %arg12[%c0_125, %c64] : memref<64x72xbf16, #tpu.memory_space<vmem>>, vector<64x8xbf16>
    tpu.vector_store %arg12[%c0_125, %c64], %103 {strides = array<i32>} : memref<64x72xbf16, #tpu.memory_space<vmem>>, vector<64x8xbf16>,
    %c0_126 = arith.constant 0 : index
    %c0_127 = arith.constant 0 : index
    %105 = vector.load %arg12[%c0_126, %c0_127] : memref<64x72xbf16, #tpu.memory_space<vmem>>, vector<64x72xbf16>
    %c0_128 = arith.constant 0 : index
    %c0_129 = arith.constant 0 : index
    %106 = vector.load %arg4[%c0_128, %c0_129] : memref<72x8xbf16, #tpu.memory_space<vmem>>, vector<72x8xbf16>
    %cst_130 = arith.constant dense<0.000000e+00> : vector<64x8xf32>
    %107 = tpu.matmul %105, %106, %cst_130 {dimension_numbers = #tpu.dot_dimension_numbers<[1], [0], [0], [1], [0, 0, 1, 1], [], []>} : vector<64x72xbf16>, vector<72x8xbf16>, vector<64x8xf32> -> vector<64x8xf32>
    %c0_131 = arith.constant 0 : index
    %c0_132 = arith.constant 0 : index
    %108 = vector.load %arg5[%c0_131, %c0_132] : memref<1x8xf32, #tpu.memory_space<vmem>>, vector<1x8xf32>
    %109 = vector.broadcast %108 : vector<1x8xf32> to vector<64x8xf32>
    %110 = arith.addf %107, %109 : vector<64x8xf32>
    %111 = arith.addf %110, %60 : vector<64x8xf32>
    %cst_133 = arith.constant 0.000000e+00 : f32
    %112 = vector.broadcast %cst_133 : f32 to vector<64x8xf32>
    %113 = arith.maximumf %111, %112 : vector<64x8xf32>
    %114 = tpu.transpose %113, [1, 0] : vector<64x8xf32> -> vector<8x64xf32>
    %c0_134 = arith.constant 0 : index
    %c0_135 = arith.constant 0 : index
    %c0_136 = arith.constant 0 : index
    %115 = vector.load %arg8[%c0_134, %c0_135, %c0_136] : memref<1x8x64xf32, #tpu.memory_space<vmem>>, vector<1x8x64xf32>
    %116 = vector.shape_cast %115 : vector<1x8x64xf32> to vector<8x64xf32>
    %117 = vector.shape_cast %114 : vector<8x64xf32> to vector<1x8x64xf32>
    tpu.vector_store %arg8[%c0_134, %c0_135, %c0_136], %117 {strides = array<i32>} : memref<1x8x64xf32, #tpu.memory_space<vmem>>, vector<1x8x64xf32>,
    return
  }
  func.func @transform_0(%arg0: i32) -> (i32, i32, i32, i32) {
    %c0_i32 = arith.constant 0 : i32
    %c0_i32_0 = arith.constant 0 : i32
    %c0_i32_1 = arith.constant 0 : i32
    %c0_i32_2 = arith.constant 0 : i32
    return %arg0, %c0_i32, %c0_i32_0, %c0_i32_1 : i32, i32, i32, i32
  }
  func.func @transform_1(%arg0: i32) -> (i32, i32) {
    %c0_i32 = arith.constant 0 : i32
    %c0_i32_0 = arith.constant 0 : i32
    %c0_i32_1 = arith.constant 0 : i32
    return %c0_i32, %c0_i32_0 : i32, i32
  }
  func.func @transform_2(%arg0: i32) -> (i32, i32) {
    %c0_i32 = arith.constant 0 : i32
    %c0_i32_0 = arith.constant 0 : i32
    %c0_i32_1 = arith.constant 0 : i32
    return %c0_i32, %c0_i32_0 : i32, i32
  }
  func.func @transform_3(%arg0: i32) -> (i32, i32) {
    %c0_i32 = arith.constant 0 : i32
    %c0_i32_0 = arith.constant 0 : i32
    %c0_i32_1 = arith.constant 0 : i32
    return %c0_i32, %c0_i32_0 : i32, i32
  }
  func.func @transform_4(%arg0: i32) -> (i32, i32) {
    %c0_i32 = arith.constant 0 : i32
    %c0_i32_0 = arith.constant 0 : i32
    %c0_i32_1 = arith.constant 0 : i32
    return %c0_i32, %c0_i32_0 : i32, i32
  }
  func.func @transform_5(%arg0: i32) -> (i32, i32) {
    %c0_i32 = arith.constant 0 : i32
    %c0_i32_0 = arith.constant 0 : i32
    %c0_i32_1 = arith.constant 0 : i32
    return %c0_i32, %c0_i32_0 : i32, i32
  }
  func.func @transform_6(%arg0: i32) -> (i32, i32) {
    %c0_i32 = arith.constant 0 : i32
    %c0_i32_0 = arith.constant 0 : i32
    %c0_i32_1 = arith.constant 0 : i32
    return %c0_i32, %c0_i32_0 : i32, i32
  }
  func.func @transform_7(%arg0: i32) -> (i32, i32, i32) {
    %c0_i32 = arith.constant 0 : i32
    %c0_i32_0 = arith.constant 0 : i32
    %c0_i32_1 = arith.constant 0 : i32
    return %arg0, %c0_i32, %c0_i32_0 : i32, i32, i32
  }
}

</mosaic_0001>

<bundles_post_ra>
// kernel: tpu_custom_call.1
= control target key start
LH: loop header
LB: loop body
LE: loop exit
PB: predicated region body
PF: predicated region fallthrough
CT: control target
= control target key end

     0   :  { %12 = vsyncpa [#allocation7], 0  ;;  %s2764_s0 = inlined_call_operand.vmem [shape: f32[2,16,16,4], index: 0, kind: input, shape index: {}]   ;;  %s2765_s1 = inlined_call_operand.vmem [shape: bf16[36,8], index: 1, kind: input, shape index: {}]   ;;  %s2766_s2 = inlined_call_operand.vmem [shape: f32[1,8], index: 2, kind: input, shape index: {}]   ;;  %s2767_s3 = inlined_call_operand.vmem [shape: bf16[72,8], index: 3, kind: input, shape index: {}]   ;;  %s2768_s4 = inlined_call_operand.vmem [shape: f32[1,8], index: 4, kind: input, shape index: {}]   ;;  %s2769_s5 = inlined_call_operand.vmem [shape: bf16[4,8], index: 5, kind: input, shape index: {}]   ;;  %s2770_s6 = inlined_call_operand.vmem [shape: f32[1,8], index: 6, kind: input, shape index: {}]   ;;  %s2771_s7 = inlined_call_operand.hbm [shape: f32[2,8,64], index: 7, kind: output, shape index: {}]  }
   0x1   :  { %14 = vsyncpa [#allocation7 + $0x1], 0  ;;  %s2182_s24 = smov 0   ;;  %s2184_s25 = smov 0  }
   0x2   :  { %s2186_s26 = smov 0   ;;  %s2188_s27 = smov 0  }
   0x3 LB: > { %s2203_s28 = sadd.s32 4294967295, %s2127_s27   ;;  %s1911_s29 = sadd.s32 4294967294, %s2127_s27   ;;  %s2127_s27 = sphi %s2188_s27, %s2777_s27   ;;  %s2123_s26 = sphi %s2186_s26, %s2776_s26   ;;  %s2119_s25 = sphi %s2184_s25, %s2775_s25   ;;  %s2115_s24 = sphi %s2182_s24, %s2774_s24  }
   0x4   : > { %s2207_s30 = sadd.s32 1, %s2127_s27   ;;  %s179_s8 = sadd.s32 1, %s2123_s26 }
   0x5   : > { %s176_s9 = ssub.s32 %s2127_s27, %s2207_s30  ;;  %p189_p0 = scmp.ne.s32.totalorder %s2123_s26, %s2119_s25 }
   0x6   : > { %p177_p1 = scmp.eq.s32.totalorder %s176_s9, 0  ;;  %p190_p2 = scmp.eq.s32.totalorder %s2203_s28, 1 }
   0x7   : > { %p195_p3 = scmp.ne.s32.totalorder %s2119_s25, %s2115_s24  ;;  %p196_p4 = scmp.eq.s32.totalorder %s1911_s29, 1 }
   0x8   : > { %s2218_s10 = scalar_select %p177_p1, %s2123_s26, %s179_s8  }
   0x9   : > { %p2220_p5 = por %p190_p2, %p189_p0  ;;  %p2224_p6 = por %p196_p4, %p195_p3 }
   0xa   : > { %p1914_p7 = scmp.ge.s32.totalorder %s2127_s27, 1  ;;  %p240_p8 = scmp.lt.s32.totalorder %s2127_s27, 3 }
   0xc   : > { %p241_p9 = pnand %p1914_p7, %p240_p8 }
   0xd   : > { %s2130_s13 = smov (!%p241_p9), 4   ;;  %s2131_s14 = smov (!%p241_p9), 8  }
   0xe   : > { %244 = sbr.rel (%p241_p9) target bundleno = 885 (0x375), region = 48  ;;  %p272_p10 = scmp.lt.s32.totalorder (!%p241_p9), %s2203_s28, 1 }
   0xf   : > { %s2132_s20 = smov (!%p241_p9), 12   ;;  %s2133_s21 = smov (!%p241_p9), 16  }
  0x10   : > { %s2134_s22 = smov (!%p241_p9), 24   ;;  %s2135_s23 = smov (!%p241_p9), 20  }
  0x11   : > { %s2136_s29 = smov (!%p241_p9), 28   ;;  %s2137_s8 = smov (!%p241_p9), 32  }
  0x13   : > { %vm278_vm0 = vcmask 31744   ;;  %vm281_vm1 = vcmask 25600   ;;  %v2129_v0 = vmov 0.0   ;;  %vm287_vm2 = vcmask 24576   ;;  %s273_s15 = scalar_select %p272_p10, %s2203_s28, 1 }
  0x14   : > { %279 = vst.msk [vmem:[#allocation2] sm:$0xff] %vm278_vm0, %v2129_v0  ;;  %vm412_vm3 = vcmask 27648   ;;  %vm477_vm4 = vcmask 60448   ;;  %vm542_vm5 = vcmask 93248   ;;  %vm606_vm6 = vcmask 126048  }
  0x15   : > { %280 = vst.msk [vmem:[#allocation2 + $0x8] sm:$0xff] %vm278_vm0, %v2129_v0  ;;  %s1990_s16 = sshll.u32 %s273_s15, 8  ;;  %vm1005_vm7 = vcmask 1041408   ;;  %vm671_vm8 = vcmask 158848   ;;  %vm736_vm9 = vcmask 191648   ;;  %vm801_vm10 = vcmask 224448  }
  0x16   : > { %282 = vst.msk [vmem:[#allocation2 + $0x10] sm:$0x3] %vm281_vm1, %v2129_v0  ;;  %s2266_s19 = scalar_lea.vmem %s2764_s0, %s1990_s16  ;;  %vm866_vm11 = vcmask 257248   ;;  %vm931_vm12 = vcmask 290048   ;;  %vm992_vm13 = vcmask 293888   ;;  %vm1109_vm14 = vcmask 58368  }
  0x17   : > { %288 = vst.msk [vmem:[#allocation2] sm:$0x1] %vm287_vm2, %v2129_v0  ;;  %v326_v5 = vld [vmem:[%s2266_s19 + $0x10] sm:$0xff]  ;;  %v327_v6 = vld [vmem:[%s2266_s19 + $0x18] sm:$0xff]  ;;  %v328_v7 = vld [vmem:[%s2266_s19 + $0x20] sm:$0xff]  ;;  %vm1107_vm15 = vcmask 64512  }
  0x18   : > { %289 = vst.msk [vmem:[#allocation2 + $0x18] sm:$0x1] %vm287_vm2, %v2129_v0  ;;  %v329_v8 = vld [vmem:[%s2266_s19 + $0x28] sm:$0xff]  ;;  %v324_v9 = vld [vmem:[%s2266_s19] sm:$0xff]  ;;  %v330_v11 = vld [vmem:[%s2266_s19 + $0x30] sm:$0xff]  ;;  %vm1114_vm1 = vcmask 57344  }
  0x19   : > { %290 = vst.msk [vmem:[#allocation2 + $0x30] sm:$0x1] %vm287_vm2, %v2129_v0  ;;  %v325_v10 = vld [vmem:[%s2266_s19 + $0x8] sm:$0xff]  ;;  %v331_v12 = vld [vmem:[%s2266_s19 + $0x38] sm:$0xff]  ;;  %v334_v17 = vld [vmem:[%s2266_s19 + $0x50] sm:$0xff]  ;;  %s2141_s15 = smov 56  }
  0x1a   : > { %291 = vst.msk [vmem:[#allocation2 + $0x48] sm:$0x1] %vm287_vm2, %v2129_v0  ;;  %v335_v18 = vld [vmem:[%s2266_s19 + $0x58] sm:$0xff]  ;;  %v332_v26 = vld [vmem:[%s2266_s19 + $0x40] sm:$0xff]  ;;  %v333_v27 = vld [vmem:[%s2266_s19 + $0x48] sm:$0xff] }
  0x1b   : > { %292 = vst.msk [vmem:[#allocation2 + $0x60] sm:$0x1] %vm287_vm2, %v2129_v0  ;;  %v336_v28 = vld [vmem:[%s2266_s19 + $0x60] sm:$0xff]  ;;  %v337_v29 = vld [vmem:[%s2266_s19 + $0x68] sm:$0xff]  ;;  %v338_v42 = vld [vmem:[%s2266_s19 + $0x70] sm:$0xff] }
  0x1c   : > { %v422_v1 = vld [vmem:[#allocation2 + $0x1] ss:$2 sm:$0xff]  ;;  %293 = vst.msk [vmem:[#allocation2 + $0x78] sm:$0x1] %vm287_vm2, %v2129_v0  ;;  %v339_v43 = vld [vmem:[%s2266_s19 + $0x78] sm:$0xff]  ;;  %v342_v56 = vld [vmem:[%s2266_s19 + $0x90] sm:$0xff] }
  0x1d   : > { %v487_v2 = vld [vmem:[#allocation2 + $0x2] ss:$2 sm:$0xff]  ;;  %v437_v3 = vpack.c.bf16 %v422_v1, %v422_v1  ;;  %294 = vst.msk [vmem:[#allocation2 + $0x90] sm:$0x1] %vm287_vm2, %v2129_v0  ;;  %v343_v57 = vld [vmem:[%s2266_s19 + $0x98] sm:$0xff] }
  0x1e   : > { %v502_v4 = vpack.c.bf16 %v487_v2, %v487_v2  ;;  %295 = vst.msk [vmem:[#allocation2 + $0xa8] sm:$0x1] %vm287_vm2, %v2129_v0  ;;  %v340_v1 = vld [vmem:[%s2266_s19 + $0x80] sm:$0xff]  ;;  %v341_v2 = vld [vmem:[%s2266_s19 + $0x88] sm:$0xff] }
  0x1f   : > { %453 = vrot.lane.b32.xlu0 %v437_v3, %s2130_s13  ;;  %296 = vst.msk [vmem:[#allocation2 + $0xc0] sm:$0x1] %vm287_vm2, %v2129_v0  ;;  %v344_v3 = vld [vmem:[%s2266_s19 + $0xa0] sm:$0xff] }
  0x20   : > { %518 = vrot.lane.b32.xlu1 %v502_v4, %s2131_s14  ;;  %297 = vst.msk [vmem:[#allocation2 + $0xd8] sm:$0x1] %vm287_vm2, %v2129_v0  ;;  %v345_v4 = vld [vmem:[%s2266_s19 + $0xa8] sm:$0xff] }
  0x21   : > { %298 = vst.msk [vmem:[#allocation2 + $0xf0] sm:$0x1] %vm287_vm2, %v2129_v0 }
  0x22   : > { %299 = vst.msk [vmem:[#allocation2 + $0x108] sm:$0x1] %vm287_vm2, %v2129_v0 }
  0x23   : > { %300 = vst.msk [vmem:[#allocation2 + $0x120] sm:$0x1] %vm287_vm2, %v2129_v0 }
  0x24   : > { %301 = vst.msk [vmem:[#allocation2 + $0x138] sm:$0x1] %vm287_vm2, %v2129_v0 }
  0x25   : > { %302 = vst.msk [vmem:[#allocation2 + $0x150] sm:$0x1] %vm287_vm2, %v2129_v0 }
  0x26   : > { %303 = vst.msk [vmem:[#allocation2 + $0x168] sm:$0x1] %vm287_vm2, %v2129_v0 }
  0x27   : > { %304 = vst.msk [vmem:[#allocation2 + $0x180] sm:$0x1] %vm287_vm2, %v2129_v0  ;;  %vm1160_vm2 = vcmask 60416  }
  0x28   : > { %359 = vst.msk [vmem:[#allocation2 + $0x31] sm:$0xff] %vm278_vm0, %v326_v5 }
  0x29   : > { %360 = vst.msk [vmem:[#allocation2 + $0x39] sm:$0xff] %vm278_vm0, %v327_v6 }
  0x2a   : > { %361 = vst.msk [vmem:[#allocation2 + $0x49] sm:$0xff] %vm278_vm0, %v328_v7 }
  0x2b   : > { %362 = vst.msk [vmem:[#allocation2 + $0x51] sm:$0xff] %vm278_vm0, %v329_v8 }
  0x2c   : > { %357 = vst.msk [vmem:[#allocation2 + $0x19] sm:$0xff] %vm278_vm0, %v324_v9 }
  0x2d   : > { %358 = vst.msk [vmem:[#allocation2 + $0x21] sm:$0xff] %vm278_vm0, %v325_v10 }
  0x2e   : > { %363 = vst.msk [vmem:[#allocation2 + $0x61] sm:$0xff] %vm278_vm0, %v330_v11 }
  0x2f   : > { %364 = vst.msk [vmem:[#allocation2 + $0x69] sm:$0xff] %vm278_vm0, %v331_v12 }
  0x30   : > { %v489_v13 = vld [vmem:[#allocation2 + $0x32] ss:$2 sm:$0xff]  ;;  %v424_v14 = vld [vmem:[#allocation2 + $0x31] ss:$2 sm:$0xff]  ;;  %367 = vst.msk [vmem:[#allocation2 + $0x91] sm:$0xff] %vm278_vm0, %v334_v17 }
  0x31   : > { %v503_v15 = vpack.c.bf16 %v489_v13, %v489_v13  ;;  %v438_v16 = vpack.c.bf16 %v424_v14, %v424_v14  ;;  %368 = vst.msk [vmem:[#allocation2 + $0x99] sm:$0xff] %vm278_vm0, %v335_v18  ;;  %v746_v31 = vld [vmem:[#allocation2 + $0x30] ss:$2 sm:$0xff]  ;;  %v811_v38 = vld [vmem:[#allocation2 + $0x31] ss:$2 sm:$0xff] }
  0x32   : > { %v618_v19 = vld [vmem:[#allocation2 + $0x49] ss:$2 sm:$0xff]  ;;  %v553_v25 = vld [vmem:[#allocation2 + $0x48] ss:$2 sm:$0xff]  ;;  %365 = vst.msk [vmem:[#allocation2 + $0x79] sm:$0xff] %vm278_vm0, %v332_v26  ;;  %v761_v33 = vpack.c.bf16 %v746_v31, %v746_v31  ;;  %v826_v40 = vpack.c.bf16 %v811_v38, %v811_v38  ;;  %v347_v18 = vld [vmem:[%s2266_s19 + $0xb8] sm:$0xff] }
  0x33   : > { %520 = vrot.lane.b32.xlu1 %v503_v15, %s2131_s14  ;;  %455 = vrot.lane.b32.xlu0 %v438_v16, %s2130_s13  ;;  %v632_v23 = vpack.c.bf16 %v618_v19, %v618_v19  ;;  %366 = vst.msk [vmem:[#allocation2 + $0x81] sm:$0xff] %vm278_vm0, %v333_v27  ;;  %v567_v30 = vpack.c.bf16 %v553_v25, %v553_v25  ;;  %v683_v32 = vld [vmem:[#allocation2 + $0x4a] ss:$2 sm:$0xff] }
  0x34   : > { %v616_v20 = vld [vmem:[#allocation2 + $0x19] ss:$2 sm:$0xff]  ;;  %v551_v21 = vld [vmem:[#allocation2 + $0x18] ss:$2 sm:$0xff]  ;;  %369 = vst.msk [vmem:[#allocation2 + $0xa9] sm:$0xff] %vm278_vm0, %v336_v28  ;;  %v697_v34 = vpack.c.bf16 %v683_v32, %v683_v32  ;;  %v346_v17 = vld [vmem:[%s2266_s19 + $0xb0] sm:$0xff] }
  0x35   : > { %v566_v22 = vpack.c.bf16 %v551_v21, %v551_v21  ;;  %v631_v24 = vpack.c.bf16 %v616_v20, %v616_v20  ;;  %370 = vst.msk [vmem:[#allocation2 + $0xb1] sm:$0xff] %vm278_vm0, %v337_v29  ;;  %v681_v35 = vld [vmem:[#allocation2 + $0x1a] ss:$2 sm:$0xff] }
  0x36   : > { %v696_v36 = vpack.c.bf16 %v681_v35, %v681_v35  ;;  %v813_v37 = vld [vmem:[#allocation2 + $0x61] ss:$2 sm:$0xff]  ;;  %v748_v41 = vld [vmem:[#allocation2 + $0x60] ss:$2 sm:$0xff]  ;;  %371 = vst.msk [vmem:[#allocation2 + $0xc1] sm:$0xff] %vm278_vm0, %v338_v42 }
  0x37   : > { %582 = vrot.lane.b32.xlu2 %v566_v22, %s2132_s20  ;;  %v827_v39 = vpack.c.bf16 %v813_v37, %v813_v37  ;;  %372 = vst.msk [vmem:[#allocation2 + $0xc9] sm:$0xff] %vm278_vm0, %v339_v43  ;;  %v762_v44 = vpack.c.bf16 %v748_v41, %v748_v41  ;;  %v426_v45 = vld [vmem:[#allocation2 + $0x61] ss:$2 sm:$0xff]  ;;  %v878_v46 = vld [vmem:[#allocation2 + $0x62] ss:$2 sm:$0xff] }
  0x38   : > { %v439_v47 = vpack.c.bf16 %v426_v45, %v426_v45  ;;  %v892_v48 = vpack.c.bf16 %v878_v46, %v878_v46  ;;  %v876_v49 = vld [vmem:[#allocation2 + $0x32] ss:$2 sm:$0xff]  ;;  %v491_v52 = vld [vmem:[#allocation2 + $0x62] ss:$2 sm:$0xff]  ;;  %v428_v55 = vld [vmem:[#allocation2 + $0x91] ss:$2 sm:$0xff] }
  0x39   : > { %v891_v50 = vpack.c.bf16 %v876_v49, %v876_v49  ;;  %v493_v51 = vld [vmem:[#allocation2 + $0x92] ss:$2 sm:$0xff]  ;;  %v504_v54 = vpack.c.bf16 %v491_v52, %v491_v52  ;;  %375 = vst.msk [vmem:[#allocation2 + $0xf1] sm:$0xff] %vm278_vm0, %v342_v56  ;;  %v440_v58 = vpack.c.bf16 %v428_v55, %v428_v55  ;;  %v815_v12 = vld [vmem:[#allocation2 + $0x91] ss:$2 sm:$0xff]  ;;  %v349_v52 = vld [vmem:[%s2266_s19 + $0xc8] sm:$0xff] }
  0x3a   : > { %v505_v53 = vpack.c.bf16 %v493_v51, %v493_v51  ;;  %376 = vst.msk [vmem:[#allocation2 + $0xf9] sm:$0xff] %vm278_vm0, %v343_v57  ;;  %v620_v59 = vld [vmem:[#allocation2 + $0x79] ss:$2 sm:$0xff]  ;;  %v555_v63 = vld [vmem:[#allocation2 + $0x78] ss:$2 sm:$0xff]  ;;  %v828_v14 = vpack.c.bf16 %v815_v12, %v815_v12  ;;  %v350_v43 = vld [vmem:[%s2266_s19 + $0xd0] sm:$0xff] }
  0x3b   : > { %649 = vrot.lane.b32.xlu1 %v632_v23, %s2133_s21  ;;  %647 = vrot.lane.b32.xlu0 %v631_v24, %s2133_s21  ;;  %v633_v61 = vpack.c.bf16 %v620_v59, %v620_v59  ;;  %373 = vst.msk [vmem:[#allocation2 + $0xd9] sm:$0xff] %vm278_vm0, %v340_v1  ;;  %v568_v5 = vpack.c.bf16 %v555_v63, %v555_v63  ;;  %v685_v7 = vld [vmem:[#allocation2 + $0x7a] ss:$2 sm:$0xff] }
  0x3c   : > { %v557_v60 = vld [vmem:[#allocation2 + $0xa8] ss:$2 sm:$0xff]  ;;  %374 = vst.msk [vmem:[#allocation2 + $0xe1] sm:$0xff] %vm278_vm0, %v341_v2  ;;  %v698_v9 = vpack.c.bf16 %v685_v7, %v685_v7  ;;  %v622_v10 = vld [vmem:[#allocation2 + $0xa9] ss:$2 sm:$0xff]  ;;  %v348_v51 = vld [vmem:[%s2266_s19 + $0xc0] sm:$0xff] }
  0x3d   : > { %v569_v62 = vpack.c.bf16 %v557_v60, %v557_v60  ;;  %v687_v6 = vld [vmem:[#allocation2 + $0xaa] ss:$2 sm:$0xff]  ;;  %377 = vst.msk [vmem:[#allocation2 + $0x109] sm:$0xff] %vm278_vm0, %v344_v3  ;;  %v634_v11 = vpack.c.bf16 %v622_v10, %v622_v10  ;;  %v352_v60 = vld [vmem:[%s2266_s19 + $0xe0] sm:$0xff] }
  0x3e   : > { %378 = vst.msk [vmem:[#allocation2 + $0x111] sm:$0xff] %vm278_vm0, %v345_v4  ;;  %v699_v8 = vpack.c.bf16 %v687_v6, %v687_v6  ;;  %v752_v13 = vld [vmem:[#allocation2 + $0xc0] ss:$2 sm:$0xff]  ;;  %v750_v16 = vld [vmem:[#allocation2 + $0x90] ss:$2 sm:$0xff] }
  0x3f   : > { %584 = vrot.lane.b32.xlu2 %v567_v30, %s2132_s20  ;;  %v764_v15 = vpack.c.bf16 %v752_v13, %v752_v13  ;;  %379 = vst.msk [vmem:[#allocation2 + $0x121] sm:$0xff] %vm278_vm0, %v346_v17  ;;  %v763_v19 = vpack.c.bf16 %v750_v16, %v750_v16  ;;  %v882_v20 = vld [vmem:[#allocation2 + $0xc2] ss:$2 sm:$0xff]  ;;  %v880_v21 = vld [vmem:[#allocation2 + $0x92] ss:$2 sm:$0xff] }
  0x40   : > { %380 = vst.msk [vmem:[#allocation2 + $0x129] sm:$0xff] %vm278_vm0, %v347_v18  ;;  %v894_v22 = vpack.c.bf16 %v882_v20, %v882_v20  ;;  %v893_v23 = vpack.c.bf16 %v880_v21, %v880_v21  ;;  %v817_v24 = vld [vmem:[#allocation2 + $0xc1] ss:$2 sm:$0xff]  ;;  %v389_v25 = vld [vmem:[#allocation2] ss:$2 sm:$0xff] }
  0x41   : > { %v829_v26 = vpack.c.bf16 %v817_v24, %v817_v24  ;;  %v404_v28 = vpack.c.bf16 %v389_v25, %v389_v25  ;;  %v432_v29 = vld [vmem:[#allocation2 + $0xf1] ss:$2 sm:$0xff]  ;;  %v495_v30 = vld [vmem:[#allocation2 + $0xc2] ss:$2 sm:$0xff]  ;;  %v497_v42 = vld [vmem:[#allocation2 + $0xf2] ss:$2 sm:$0xff] }
  0x42   : > { %v442_v32 = vpack.c.bf16 %v432_v29, %v432_v29  ;;  %v391_v35 = vld [vmem:[#allocation2 + $0x30] ss:$2 sm:$0xff]  ;;  %383 = vst.msk [vmem:[#allocation2 + $0x151] sm:$0xff] %vm278_vm0, %v350_v43  ;;  %v507_v45 = vpack.c.bf16 %v497_v42, %v497_v42  ;;  %v819_v6 = vld [vmem:[#allocation2 + $0xf1] ss:$2 sm:$0xff]  ;;  %v1996_v21 = vld [vmem:[%s2765_s1 + $0x8] sm:$0xff] }
  0x43   : > { %777 = vrot.lane.b32.xlu1 %v761_v33, %s2134_s22  ;;  %714 = vrot.lane.b32.xlu0 %v697_v34, %s2135_s23  ;;  %413 = vst.msk [vmem:[#allocation4] sm:$0xf] %vm412_vm3, %v404_v28  ;;  %v506_v33 = vpack.c.bf16 %v495_v30, %v495_v30  ;;  %v430_v34 = vld [vmem:[#allocation2 + $0xc1] ss:$2 sm:$0xff]  ;;  %v405_v37 = vpack.c.bf16 %v391_v35, %v391_v35  ;;  %v559_v38 = vld [vmem:[#allocation2 + $0xd8] ss:$2 sm:$0xff] }
  0x44   : > { %381 = vst.msk [vmem:[#allocation2 + $0x139] sm:$0xff] %vm278_vm0, %v348_v51  ;;  %v754_v55 = vld [vmem:[#allocation2 + $0xf0] ss:$2 sm:$0xff]  ;;  %v830_v10 = vpack.c.bf16 %v819_v6, %v819_v6  ;;  %v1995_v28 = vld [vmem:[%s2765_s1] sm:$0xff] }
  0x45   : > { %414 = vst.msk [vmem:[#allocation4 + $0x4] sm:$0xf] %vm412_vm3, %v405_v37  ;;  %v626_v46 = vld [vmem:[#allocation2 + $0x109] ss:$2 sm:$0xff]  ;;  %v765_v57 = vpack.c.bf16 %v754_v55, %v754_v55  ;;  %v691_v59 = vld [vmem:[#allocation2 + $0x10a] ss:$2 sm:$0xff] }
  0x46   : > { %382 = vst.msk [vmem:[#allocation2 + $0x141] sm:$0xff] %vm278_vm0, %v349_v52  ;;  %v701_v63 = vpack.c.bf16 %v691_v59, %v691_v59  ;;  %v884_v2 = vld [vmem:[#allocation2 + $0xf2] ss:$2 sm:$0xff] }
  0x47   : > { %712 = vrot.lane.b32.xlu2 %v696_v36, %s2135_s23  ;;  %v441_v36 = vpack.c.bf16 %v430_v34, %v430_v34  ;;  %v756_v56 = vld [vmem:[#allocation2 + $0x120] ss:$2 sm:$0xff]  ;;  %385 = vst.msk [vmem:[#allocation2 + $0x169] sm:$0xff] %vm278_vm0, %v352_v60  ;;  %v821_v1 = vld [vmem:[#allocation2 + $0x121] ss:$2 sm:$0xff]  ;;  %v895_v4 = vpack.c.bf16 %v884_v2, %v884_v2  ;;  %v354_v25 = vld [vmem:[%s2266_s19 + $0xf0] sm:$0xff] }
  0x48   : > { %v831_v3 = vpack.c.bf16 %v821_v1, %v821_v1  ;;  %v434_v12 = vld [vmem:[#allocation2 + $0x121] ss:$2 sm:$0xff]  ;;  %v395_v20 = vld [vmem:[#allocation2 + $0x90] ss:$2 sm:$0xff]  ;;  %387 = vst.msk [vmem:[#allocation2 + $0x181] sm:$0xff] %vm278_vm0, %v354_v25 }
  0x49   : > { %v443_v18 = vpack.c.bf16 %v434_v12, %v434_v12  ;;  %v499_v35 = vld [vmem:[#allocation2 + $0x122] ss:$2 sm:$0xff]  ;;  %1108 = vst.msk [vmem:[#allocation3] sm:$0xff] %vm1107_vm15, %v2129_v0 }
  0x4a   : > { %v508_v37 = vpack.c.bf16 %v499_v35, %v499_v35  ;;  %1110 = vst.msk [vmem:[#allocation3 + $0x8] sm:$0x3] %vm1109_vm14, %v2129_v0 }
  0x4b   : > { %844 = vrot.lane.b32.xlu1 %v827_v39, %s2136_s29  ;;  %842 = vrot.lane.b32.xlu0 %v826_v40, %s2136_s29  ;;  %v561_v39 = vld [vmem:[#allocation2 + $0x108] ss:$2 sm:$0xff]  ;;  %v570_v40 = vpack.c.bf16 %v559_v38, %v559_v38  ;;  %1125 = vst.msk [vmem:[#allocation3 + $0x9] sm:$0x1] %vm1114_vm1, %v2129_v0 }
  0x4c   : > { %v571_v41 = vpack.c.bf16 %v561_v39, %v561_v39  ;;  %1112 = vst.msk [vmem:[#allocation3 + $0x90] sm:$0xff] %vm1107_vm15, %v2129_v0 }
  0x4d   : > { %v563_v30 = vld [vmem:[#allocation2 + $0x138] ss:$2 sm:$0xff]  ;;  %v628_v38 = vld [vmem:[#allocation2 + $0x139] ss:$2 sm:$0xff]  ;;  %1113 = vst.msk [vmem:[#allocation3 + $0x98] sm:$0x3] %vm1109_vm14, %v2129_v0 }
  0x4e   : > { %v572_v34 = vpack.c.bf16 %v563_v30, %v563_v30  ;;  %v637_v42 = vpack.c.bf16 %v628_v38, %v628_v38  ;;  %1115 = vst.msk [vmem:[#allocation3] sm:$0x1] %vm1114_vm1, %v2129_v0 }
  0x4f   : > { %779 = vrot.lane.b32.xlu2 %v762_v44, %s2134_s22  ;;  %v351_v44 = vld [vmem:[%s2266_s19 + $0xd8] sm:$0xff]  ;;  %1116 = vst.msk [vmem:[#allocation3 + $0x10] sm:$0x1] %vm1114_vm1, %v2129_v0 }
  0x50   : > { %384 = vst.msk [vmem:[#allocation2 + $0x159] sm:$0xff] %vm278_vm0, %v351_v44 }
  0x51   : > { %1117 = vst.msk [vmem:[#allocation3 + $0x20] sm:$0x1] %vm1114_vm1, %v2129_v0 }
  0x52   : > { %1118 = vst.msk [vmem:[#allocation3 + $0x30] sm:$0x1] %vm1114_vm1, %v2129_v0 }
  0x53   : > { %457 = vrot.lane.b32.xlu1 %v439_v47, %s2130_s13  ;;  %909 = vrot.lane.b32.xlu0 %v892_v48, %s2137_s8  ;;  %v689_v47 = vld [vmem:[#allocation2 + $0xda] ss:$2 sm:$0xff]  ;;  %v636_v48 = vpack.c.bf16 %v626_v46, %v626_v46  ;;  %1119 = vst.msk [vmem:[#allocation3 + $0x40] sm:$0x1] %vm1114_vm1, %v2129_v0 }
  0x54   : > { %v700_v49 = vpack.c.bf16 %v689_v47, %v689_v47  ;;  %1120 = vst.msk [vmem:[#allocation3 + $0x50] sm:$0x1] %vm1114_vm1, %v2129_v0 }
  0x55   : > { %1121 = vst.msk [vmem:[#allocation3 + $0x60] sm:$0x1] %vm1114_vm1, %v2129_v0 }
  0x56   : > { %1122 = vst.msk [vmem:[#allocation3 + $0x70] sm:$0x1] %vm1114_vm1, %v2129_v0 }
  0x57   : > { %907 = vrot.lane.b32.xlu2 %v891_v50, %s2137_s8  ;;  %v624_v50 = vld [vmem:[#allocation2 + $0xd9] ss:$2 sm:$0xff]  ;;  %v501_v29 = vld [vmem:[#allocation2 + $0x152] ss:$2 sm:$0xff]  ;;  %1123 = vst.msk [vmem:[#allocation3 + $0x80] sm:$0x1] %vm1114_vm1, %v2129_v0 }
  0x58   : > { %v436_v13 = vld [vmem:[#allocation2 + $0x151] ss:$2 sm:$0xff]  ;;  %1126 = vst.msk [vmem:[#allocation3 + $0x19] sm:$0x1] %vm1114_vm1, %v2129_v0 }
  0x59   : > { %1127 = vst.msk [vmem:[#allocation3 + $0x29] sm:$0x1] %vm1114_vm1, %v2129_v0 }
  0x5a   : > { %1128 = vst.msk [vmem:[#allocation3 + $0x39] sm:$0x1] %vm1114_vm1, %v2129_v0 }
  0x5b   : > { %524 = vrot.lane.b32.xlu1 %v505_v53, %s2131_s14  ;;  %522 = vrot.lane.b32.xlu0 %v504_v54, %s2131_s14  ;;  %v635_v54 = vpack.c.bf16 %v624_v50, %v624_v50  ;;  %1129 = vst.msk [vmem:[#allocation3 + $0x49] sm:$0x1] %vm1114_vm1, %v2129_v0 }
  0x5c   : > { %1130 = vst.msk [vmem:[#allocation3 + $0x59] sm:$0x1] %vm1114_vm1, %v2129_v0 }
  0x5d   : > { %1131 = vst.msk [vmem:[#allocation3 + $0x69] sm:$0x1] %vm1114_vm1, %v2129_v0 }
  0x5e   : > { %1132 = vst.msk [vmem:[#allocation3 + $0x79] sm:$0x1] %vm1114_vm1, %v2129_v0 }
  0x5f   : > { %459 = vrot.lane.b32.xlu2 %v440_v58, %s2130_s13  ;;  %v766_v58 = vpack.c.bf16 %v756_v56, %v756_v56  ;;  %v823_v56 = vld [vmem:[#allocation2 + $0x151] ss:$2 sm:$0xff]  ;;  %1133 = vst.msk [vmem:[#allocation3 + $0x89] sm:$0x1] %vm1114_vm1, %v2129_v0 }
  0x60   : > { %v832_v60 = vpack.c.bf16 %v823_v56, %v823_v56  ;;  %v1169_v56 = vld [vmem:[#allocation3 + $0x1] sm:$0xff]  ;;  %1124 = vst.msk [vmem:[#allocation3 + $0x90] sm:$0x1] %vm1114_vm1, %v2129_v0 }
  0x61   : > { %1134 = vst.msk [vmem:[#allocation3 + $0x99] sm:$0x1] %vm1114_vm1, %v2129_v0 }
  0x63   : > { %651 = vrot.lane.b32.xlu1 %v633_v61, %s2133_s21  ;;  %588 = vrot.lane.b32.xlu0 %v569_v62, %s2132_s20  ;;  %v353_v61 = vld [vmem:[%s2266_s19 + $0xe8] sm:$0xff] }
  0x64   : > { %386 = vst.msk [vmem:[#allocation2 + $0x171] sm:$0xff] %vm278_vm0, %v353_v61 }
  0x67   : > { %586 = vrot.lane.b32.xlu2 %v568_v5, %s2132_s20  ;;  %v952_v5 = vld [vmem:[%s2765_s1 + $0x10] sm:$0x3] }
  0x68   : > { %v986_v7 = vunpack.c.l.b16 %v952_v5 }
  0x6b   : > { %718 = vrot.lane.b32.xlu1 %v699_v8, %s2135_s23  ;;  %716 = vrot.lane.b32.xlu0 %v698_v9, %s2135_s23  ;;  %v989_v9 = vpack.c.b16 %v986_v7, %v986_v7  ;;  %v630_v39 = vld [vmem:[#allocation2 + $0x169] ss:$2 sm:$0xff]  ;;  %v565_v44 = vld [vmem:[#allocation2 + $0x168] ss:$2 sm:$0xff] }
  0x6c   : > { %v638_v43 = vpack.c.bf16 %v630_v39, %v630_v39  ;;  %v573_v46 = vpack.c.bf16 %v565_v44, %v565_v44  ;;  %v695_v47 = vld [vmem:[#allocation2 + $0x16a] ss:$2 sm:$0xff] }
  0x6d   : > { %v703_v51 = vpack.c.bf16 %v695_v47, %v695_v47  ;;  %v397_v7 = vld [vmem:[#allocation2 + $0xc0] ss:$2 sm:$0xff] }
  0x6f   : > { %653 = vrot.lane.b32.xlu2 %v634_v11, %s2133_s21  ;;  %v393_v11 = vld [vmem:[#allocation2 + $0x60] ss:$2 sm:$0xff] }
  0x70   : > { %v406_v17 = vpack.c.bf16 %v393_v11, %v393_v11 }
  0x72   : > { %415 = vst.msk [vmem:[#allocation4 + $0x8] sm:$0xf] %vm412_vm3, %v406_v17 }
  0x73   : > { %846 = vrot.lane.b32.xlu1 %v828_v14, %s2136_s29  ;;  %783 = vrot.lane.b32.xlu0 %v764_v15, %s2134_s22  ;;  %v1007_v14 = vsel %vm1005_vm7, %v989_v9, 0  ;;  %v888_v9 = vld [vmem:[#allocation2 + $0x152] ss:$2 sm:$0xff] }
  0x74   : > { %1014 = vmatpush.bf16.msra.mxu0 %v1007_v14 }
  0x77   : > { %781 = vrot.lane.b32.xlu2 %v763_v19, %s2134_s22  ;;  %v444_v19 = vpack.c.bf16 %v436_v13, %v436_v13  ;;  %v897_v13 = vpack.c.bf16 %v888_v9, %v888_v9 }
  0x78   : > { %1015 = vmatpush.bf16.msra.mxu0 %v1996_v21 }
  0x7b   : > { %913 = vrot.lane.b32.xlu1 %v894_v22, %s2137_s8  ;;  %911 = vrot.lane.b32.xlu0 %v893_v23, %s2137_s8  ;;  %v886_v22 = vld [vmem:[#allocation2 + $0x122] ss:$2 sm:$0xff]  ;;  %v407_v23 = vpack.c.bf16 %v395_v20, %v395_v20 }
  0x7c   : > { %1016 = vmatpush.bf16.msra.mxu0 %v1995_v28 }
  0x7d   : > { %416 = vst.msk [vmem:[#allocation4 + $0xc] sm:$0xf] %vm412_vm3, %v407_v23 }
  0x7f   : > { %848 = vrot.lane.b32.xlu2 %v829_v26, %s2136_s29  ;;  %v355_v26 = vld [vmem:[%s2266_s19 + $0xf8] sm:$0xff] }
  0x80   : > { %388 = vst.msk [vmem:[#allocation2 + $0x189] sm:$0xff] %vm278_vm0, %v355_v26 }
  0x83   : > { %463 = vrot.lane.b32.xlu0 %v442_v32, %s2130_s13  ;;  %526 = vrot.lane.b32.xlu1 %v506_v33, %s2131_s14  ;;  %v509_v33 = vpack.c.bf16 %v501_v29, %v501_v29  ;;  %v401_v29 = vld [vmem:[#allocation2 + $0x120] ss:$2 sm:$0xff] }
  0x87   : > { %461 = vrot.lane.b32.xlu2 %v441_v36, %s2130_s13  ;;  %v890_v2 = vld [vmem:[#allocation2 + $0x182] ss:$2 sm:$0xff] }
  0x88   : > { %v898_v6 = vpack.c.bf16 %v890_v2, %v890_v2  ;;  %v2540_v2 = vld [vmem:[%s2766_s2] ss:$0 sm:$0xff] }
  0x8b   : > { %590 = vrot.lane.b32.xlu0 %v570_v40, %s2132_s20  ;;  %592 = vrot.lane.b32.xlu1 %v571_v41, %s2132_s20 }
  0x8f   : > { %528 = vrot.lane.b32.xlu2 %v507_v45, %s2131_s14 }
  0x91   : > { %v454_v27 = vpop.permute.xlu0 %453  ;;  %v583_v53 = vpop.permute.xlu2 %582 }
  0x92   : > { %v519_v31 = vpop.permute.xlu1 %518  ;;  %478 = vst.msk [vmem:[#allocation4] sm:$0xf] %vm477_vm4, %v454_v27  ;;  %v896_v27 = vpack.c.bf16 %v886_v22, %v886_v22 }
  0x93   : > { %543 = vst.msk [vmem:[#allocation4] sm:$0xf] %vm542_vm5, %v519_v31  ;;  %657 = vrot.lane.b32.xlu0 %v636_v48, %s2133_s21  ;;  %720 = vrot.lane.b32.xlu1 %v700_v49, %s2135_s23  ;;  %v758_v48 = vld [vmem:[#allocation2 + $0x150] ss:$2 sm:$0xff] }
  0x94   : > { %607 = vst.msk [vmem:[#allocation4] sm:$0xf] %vm606_vm6, %v583_v53  ;;  %v767_v52 = vpack.c.bf16 %v758_v48, %v758_v48  ;;  %v693_v53 = vld [vmem:[#allocation2 + $0x13a] ss:$2 sm:$0xff] }
  0x95   : > { %v702_v55 = vpack.c.bf16 %v693_v53, %v693_v53 }
  0x97   : > { %655 = vrot.lane.b32.xlu2 %v635_v54, %s2133_s21 }
  0x99   : > { %v585_v62 = vpop.permute.xlu2 %584 }
  0x9b   : > { %785 = vrot.lane.b32.xlu0 %v765_v57, %s2134_s22  ;;  %787 = vrot.lane.b32.xlu1 %v766_v58, %s2134_s22  ;;  %v825_v57 = vld [vmem:[#allocation2 + $0x181] ss:$2 sm:$0xff] }
  0x9c   : > { %v833_v61 = vpack.c.bf16 %v825_v57, %v825_v57 }
  0x9f   : > { %722 = vrot.lane.b32.xlu2 %v701_v63, %s2135_s23 }
  0xa1   : > { %v713_v8 = vpop.permute.xlu2 %712 }
  0xa3   : > { %852 = vrot.lane.b32.xlu0 %v831_v3, %s2136_s29  ;;  %915 = vrot.lane.b32.xlu1 %v895_v4, %s2137_s8 }
  0xa5   : > { %v521_v15 = vpop.permute.xlu1 %520  ;;  %v456_v16 = vpop.permute.xlu0 %455 }
  0xa6   : > { %479 = vst.msk [vmem:[#allocation4 + $0x4] sm:$0xf] %vm477_vm4, %v456_v16 }
  0xa7   : > { %544 = vst.msk [vmem:[#allocation4 + $0x4] sm:$0xf] %vm542_vm5, %v521_v15  ;;  %850 = vrot.lane.b32.xlu2 %v830_v10, %s2136_s29  ;;  %v408_v10 = vpack.c.bf16 %v397_v7, %v397_v7 }
  0xa8   : > { %608 = vst.msk [vmem:[#allocation4 + $0x4] sm:$0xf] %vm606_vm6, %v585_v62  ;;  %v760_v62 = vld [vmem:[#allocation2 + $0x180] ss:$2 sm:$0xff] }
  0xa9   : > { %v780_v24 = vpop.permute.xlu2 %779  ;;  %v768_v1 = vpack.c.bf16 %v760_v62, %v760_v62  ;;  %417 = vst.msk [vmem:[#allocation4 + $0x10] sm:$0xf] %vm412_vm3, %v408_v10 }
  0xab   : > { %465 = vrot.lane.b32.xlu0 %v443_v18, %s2130_s13  ;;  %467 = vrot.lane.b32.xlu1 %v444_v19, %s2130_s13 }
  0xad   : > { %v650_v31 = vpop.permute.xlu1 %649  ;;  %v648_v32 = vpop.permute.xlu0 %647 }
  0xae   : > { %673 = vst.msk [vmem:[#allocation4 + $0x4] sm:$0xf] %vm671_vm8, %v650_v31  ;;  %v410_v31 = vpack.c.bf16 %v401_v29, %v401_v29 }
  0xaf   : > { %672 = vst.msk [vmem:[#allocation4] sm:$0xf] %vm671_vm8, %v648_v32  ;;  %917 = vrot.lane.b32.xlu2 %v896_v27, %s2137_s8 }
  0xb0   : > { %737 = vst.msk [vmem:[#allocation4] sm:$0xf] %vm736_vm9, %v713_v8  ;;  %v399_v8 = vld [vmem:[#allocation2 + $0xf0] ss:$2 sm:$0xff] }
  0xb1   : > { %v908_v36 = vpop.permute.xlu2 %907  ;;  %v409_v11 = vpack.c.bf16 %v399_v8, %v399_v8  ;;  %419 = vst.msk [vmem:[#allocation4 + $0x18] sm:$0xf] %vm412_vm3, %v410_v31 }
  0xb3   : > { %532 = vrot.lane.b32.xlu0 %v509_v33, %s2131_s14  ;;  %594 = vrot.lane.b32.xlu1 %v572_v34, %s2132_s20  ;;  %418 = vst.msk [vmem:[#allocation4 + $0x14] sm:$0xf] %vm412_vm3, %v409_v11  ;;  %v403_v34 = vld [vmem:[#allocation2 + $0x150] ss:$2 sm:$0xff] }
  0xb5   : > { %v778_v40 = vpop.permute.xlu1 %777  ;;  %v715_v41 = vpop.permute.xlu0 %714 }
  0xb6   : > { %802 = vst.msk [vmem:[#allocation4] sm:$0xf] %vm801_vm10, %v778_v40 }
  0xb7   : > { %738 = vst.msk [vmem:[#allocation4 + $0x4] sm:$0xf] %vm736_vm9, %v715_v41  ;;  %530 = vrot.lane.b32.xlu2 %v508_v37, %s2131_s14 }
  0xb8   : > { %803 = vst.msk [vmem:[#allocation4 + $0x4] sm:$0xf] %vm801_vm10, %v780_v24 }
  0xb9   : > { %v460_v45 = vpop.permute.xlu2 %459 }
  0xba   : > { %481 = vst.msk [vmem:[#allocation4 + $0xc] sm:$0xf] %vm477_vm4, %v460_v45 }
  0xbb   : > { %659 = vrot.lane.b32.xlu0 %v637_v42, %s2133_s21  ;;  %661 = vrot.lane.b32.xlu1 %v638_v43, %s2133_s21 }
  0xbd   : > { %v845_v49 = vpop.permute.xlu1 %844  ;;  %v843_v50 = vpop.permute.xlu0 %842 }
  0xbe   : > { %868 = vst.msk [vmem:[#allocation4 + $0x4] sm:$0xf] %vm866_vm11, %v845_v49 }
  0xbf   : > { %867 = vst.msk [vmem:[#allocation4] sm:$0xf] %vm866_vm11, %v843_v50  ;;  %596 = vrot.lane.b32.xlu2 %v573_v46, %s2132_s20  ;;  %s2138_s20 = smov 48  }
  0xc0   : > { %932 = vst.msk [vmem:[#allocation4] sm:$0xf] %vm931_vm12, %v908_v36  ;;  %v411_v36 = vpack.c.bf16 %v403_v34, %v403_v34 }
  0xc1   : > { %v587_v54 = vpop.permute.xlu2 %586 }
  0xc2   : > { %420 = vst.msk [vmem:[#allocation4 + $0x1c] sm:$0xf] %vm412_vm3, %v411_v36  ;;  %vm1217_vm3 = vcmask 126016  }
  0xc3   : > { %726 = vrot.lane.b32.xlu0 %v703_v51, %s2135_s23  ;;  %789 = vrot.lane.b32.xlu1 %v767_v52, %s2134_s22  ;;  %v1226_v52 = vld [vmem:[#allocation3 + $0x2] sm:$0xff] }
  0xc4   : > { %v1234_v53 = vpack.c.bf16 %v1226_v52, %v1226_v52 }
  0xc5   : > { %v458_v58 = vpop.permute.xlu1 %457  ;;  %v910_v59 = vpop.permute.xlu0 %909 }
  0xc6   : > { %480 = vst.msk [vmem:[#allocation4 + $0x8] sm:$0xf] %vm477_vm4, %v458_v58  ;;  %v1177_v58 = vpack.c.bf16 %v1169_v56, %v1169_v56 }
  0xc7   : > { %933 = vst.msk [vmem:[#allocation4 + $0x4] sm:$0xf] %vm931_vm12, %v910_v59  ;;  %724 = vrot.lane.b32.xlu2 %v702_v55, %s2135_s23  ;;  %s2139_s23 = smov 40  }
  0xc9   : > { %v654_v63 = vpop.permute.xlu2 %653 }
  0xcb   : > { %854 = vrot.lane.b32.xlu0 %v832_v60, %s2136_s29  ;;  %856 = vrot.lane.b32.xlu1 %v833_v61, %s2136_s29  ;;  %s2140_s29 = smov 64  }
  0xcd   : > { %v525_v3 = vpop.permute.xlu1 %524  ;;  %v523_v4 = vpop.permute.xlu0 %522 }
  0xce   : > { %546 = vst.msk [vmem:[#allocation4 + $0xc] sm:$0xf] %vm542_vm5, %v525_v3  ;;  %v1991_v5 = vld [vmem:[#allocation4] sm:$0xff]  ;;  %v1462_v3 = vld [vmem:[#allocation3 + $0x90] sm:$0xff] }
  0xcf   : > { %545 = vst.msk [vmem:[#allocation4 + $0x8] sm:$0xf] %vm542_vm5, %v523_v4  ;;  %791 = vrot.lane.b32.xlu2 %v768_v1, %s2134_s22  ;;  %1942 = vmatmul.msk.bf16.vlgmr.msra.gmra.mxu0 %vm992_vm13, %v1991_v5  ;;  %v1470_v4 = vpack.c.bf16 %v1462_v3, %v1462_v3 }
  0xd0   : > { %609 = vst.msk [vmem:[#allocation4 + $0x8] sm:$0xf] %vm606_vm6, %v587_v54 }
  0xd1   : > { %v782_v12 = vpop.permute.xlu2 %781 }
  0xd3   : > { %921 = vrot.lane.b32.xlu0 %v898_v6, %s2137_s8  ;;  %1250 = vrot.lane.b32.xlu1 %v1234_v53, %s2133_s21 }
  0xd5   : > { %v652_v14 = vpop.permute.xlu1 %651  ;;  %v589_v15 = vpop.permute.xlu0 %588 }
  0xd6   : > { %674 = vst.msk [vmem:[#allocation4 + $0x8] sm:$0xf] %vm671_vm8, %v652_v14 }
  0xd7   : > { %610 = vst.msk [vmem:[#allocation4 + $0xc] sm:$0xf] %vm606_vm6, %v589_v15  ;;  %919 = vrot.lane.b32.xlu2 %v897_v13, %s2137_s8 }
  0xd8   : > { %675 = vst.msk [vmem:[#allocation4 + $0xc] sm:$0xf] %vm671_vm8, %v654_v63 }
  0xd9   : > { %v849_v16 = vpop.permute.xlu2 %848 }
  0xdb   : > { %1493 = vrot.lane.b32.xlu0 %v1470_v4, %s2138_s20 }
  0xdd   : > { %v719_v17 = vpop.permute.xlu1 %718  ;;  %v717_v18 = vpop.permute.xlu0 %716 }
  0xde   : > { %740 = vst.msk [vmem:[#allocation4 + $0xc] sm:$0xf] %vm736_vm9, %v719_v17 }
  0xdf   : > { %739 = vst.msk [vmem:[#allocation4 + $0x8] sm:$0xf] %vm736_vm9, %v717_v18  ;;  %1193 = vrot.lane.b32.xlu2 %v1177_v58, %s2131_s14 }
  0xe0   : > { %804 = vst.msk [vmem:[#allocation4 + $0x8] sm:$0xf] %vm801_vm10, %v782_v12 }
  0xe1   : > { %v462_v19 = vpop.permute.xlu2 %461 }
  0xe2   : > { %482 = vst.msk [vmem:[#allocation4 + $0x10] sm:$0xf] %vm477_vm4, %v462_v19 }
  0xe5   : > { %v847_v20 = vpop.permute.xlu1 %846  ;;  %v784_v21 = vpop.permute.xlu0 %783 }
  0xe6   : > { %869 = vst.msk [vmem:[#allocation4 + $0x8] sm:$0xf] %vm866_vm11, %v847_v20 }
  0xe7   : > { %805 = vst.msk [vmem:[#allocation4 + $0xc] sm:$0xf] %vm801_vm10, %v784_v21 }
  0xe8   : > { %870 = vst.msk [vmem:[#allocation4 + $0xc] sm:$0xf] %vm866_vm11, %v849_v16 }
  0xe9   : > { %v529_v22 = vpop.permute.xlu2 %528 }
  0xed   : > { %v914_v23 = vpop.permute.xlu1 %913  ;;  %v912_v24 = vpop.permute.xlu0 %911 }
  0xee   : > { %935 = vst.msk [vmem:[#allocation4 + $0xc] sm:$0xf] %vm931_vm12, %v914_v23 }
  0xef   : > { %934 = vst.msk [vmem:[#allocation4 + $0x8] sm:$0xf] %vm931_vm12, %v912_v24 }
  0xf1   : > { %v656_v25 = vpop.permute.xlu2 %655 }
  0xf5   : > { %v464_v26 = vpop.permute.xlu0 %463  ;;  %v527_v27 = vpop.permute.xlu1 %526 }
  0xf6   : > { %483 = vst.msk [vmem:[#allocation4 + $0x14] sm:$0xf] %vm477_vm4, %v464_v26  ;;  %v1992_v28 = vld [vmem:[#allocation4 + $0x8] sm:$0xff] }
  0xf7   : > { %547 = vst.msk [vmem:[#allocation4 + $0x10] sm:$0xf] %vm542_vm5, %v527_v27  ;;  %1943 = vmatmul.msk.bf16.gmra.mxu0 %vm992_vm13, %v1992_v28 }
  0xf8   : > { %548 = vst.msk [vmem:[#allocation4 + $0x14] sm:$0xf] %vm542_vm5, %v529_v22 }
  0xf9   : > { %v723_v30 = vpop.permute.xlu2 %722 }
  0xfd   : > { %v591_v32 = vpop.permute.xlu0 %590  ;;  %v593_v33 = vpop.permute.xlu1 %592 }
  0xfe   : > { %611 = vst.msk [vmem:[#allocation4 + $0x10] sm:$0xf] %vm606_vm6, %v591_v32 }
  0xff   : > { %612 = vst.msk [vmem:[#allocation4 + $0x14] sm:$0xf] %vm606_vm6, %v593_v33 }
 0x100   : > { %676 = vst.msk [vmem:[#allocation4 + $0x10] sm:$0xf] %vm671_vm8, %v656_v25 }
 0x101   : > { %v851_v35 = vpop.permute.xlu2 %850 }
 0x105   : > { %v658_v37 = vpop.permute.xlu0 %657  ;;  %v721_v38 = vpop.permute.xlu1 %720 }
 0x106   : > { %677 = vst.msk [vmem:[#allocation4 + $0x14] sm:$0xf] %vm671_vm8, %v658_v37  ;;  %v1144_v37 = vld [vmem:[#allocation3] sm:$0xff] }
 0x107   : > { %741 = vst.msk [vmem:[#allocation4 + $0x10] sm:$0xf] %vm736_vm9, %v721_v38  ;;  %v1152_v38 = vpack.c.bf16 %v1144_v37, %v1144_v37  ;;  %v2001_v37 = vld [vmem:[%s2767_s3] sm:$0xff] }
 0x108   : > { %742 = vst.msk [vmem:[#allocation4 + $0x14] sm:$0xf] %vm736_vm9, %v723_v30 }
 0x109   : > { %v918_v39 = vpop.permute.xlu2 %917  ;;  %1161 = vst.msk [vmem:[#allocation5] sm:$0xf] %vm1160_vm2, %v1152_v38 }
 0x10d   : > { %v786_v40 = vpop.permute.xlu0 %785  ;;  %v788_v41 = vpop.permute.xlu1 %787 }
 0x10e   : > { %806 = vst.msk [vmem:[#allocation4 + $0x10] sm:$0xf] %vm801_vm10, %v786_v40 }
 0x10f   : > { %807 = vst.msk [vmem:[#allocation4 + $0x14] sm:$0xf] %vm801_vm10, %v788_v41 }
 0x110   : > { %871 = vst.msk [vmem:[#allocation4 + $0x10] sm:$0xf] %vm866_vm11, %v851_v35 }
 0x111   : > { %v531_v42 = vpop.permute.xlu2 %530 }
 0x115   : > { %v853_v43 = vpop.permute.xlu0 %852  ;;  %v916_v44 = vpop.permute.xlu1 %915 }
 0x116   : > { %872 = vst.msk [vmem:[#allocation4 + $0x14] sm:$0xf] %vm866_vm11, %v853_v43 }
 0x117   : > { %936 = vst.msk [vmem:[#allocation4 + $0x10] sm:$0xf] %vm931_vm12, %v916_v44 }
 0x118   : > { %937 = vst.msk [vmem:[#allocation4 + $0x14] sm:$0xf] %vm931_vm12, %v918_v39 }
 0x119   : > { %v597_v47 = vpop.permute.xlu2 %596 }
 0x11d   : > { %v466_v45 = vpop.permute.xlu0 %465  ;;  %v468_v46 = vpop.permute.xlu1 %467 }
 0x11e   : > { %484 = vst.msk [vmem:[#allocation4 + $0x18] sm:$0xf] %vm477_vm4, %v466_v45 }
 0x11f   : > { %v1993_v48 = vld [vmem:[#allocation4 + $0x10] sm:$0xff]  ;;  %485 = vst.msk [vmem:[#allocation4 + $0x1c] sm:$0xf] %vm477_vm4, %v468_v46  ;;  %vm1274_vm4 = vcmask 191616  }
 0x120   : > { %549 = vst.msk [vmem:[#allocation4 + $0x18] sm:$0xf] %vm542_vm5, %v531_v42  ;;  %1944 = vmatmul.msk.bf16.gmra.mxu0 %vm992_vm13, %v1993_v48 }
 0x121   : > { %v725_v51 = vpop.permute.xlu2 %724 }
 0x125   : > { %v533_v49 = vpop.permute.xlu0 %532  ;;  %v595_v50 = vpop.permute.xlu1 %594 }
 0x126   : > { %550 = vst.msk [vmem:[#allocation4 + $0x1c] sm:$0xf] %vm542_vm5, %v533_v49  ;;  %vm1331_vm5 = vcmask 257216  }
 0x127   : > { %613 = vst.msk [vmem:[#allocation4 + $0x18] sm:$0xf] %vm606_vm6, %v595_v50 }
 0x128   : > { %614 = vst.msk [vmem:[#allocation4 + $0x1c] sm:$0xf] %vm606_vm6, %v597_v47  ;;  %vm1388_vm6 = vcmask 322816  }
 0x129   : > { %v792_v57 = vpop.permute.xlu2 %791 }
 0x12d   : > { %v660_v54 = vpop.permute.xlu0 %659  ;;  %v662_v55 = vpop.permute.xlu1 %661 }
 0x12e   : > { %678 = vst.msk [vmem:[#allocation4 + $0x18] sm:$0xf] %vm671_vm8, %v660_v54 }
 0x12f   : > { %679 = vst.msk [vmem:[#allocation4 + $0x1c] sm:$0xf] %vm671_vm8, %v662_v55  ;;  %vm1445_vm8 = vcmask 388416  }
 0x130   : > { %743 = vst.msk [vmem:[#allocation4 + $0x18] sm:$0xf] %vm736_vm9, %v725_v51 }
 0x131   : > { %v920_v61 = vpop.permute.xlu2 %919 }
 0x135   : > { %v727_v59 = vpop.permute.xlu0 %726  ;;  %v790_v60 = vpop.permute.xlu1 %789 }
 0x136   : > { %744 = vst.msk [vmem:[#allocation4 + $0x1c] sm:$0xf] %vm736_vm9, %v727_v59  ;;  %vm1503_vm9 = vcmask 454016  }
 0x137   : > { %808 = vst.msk [vmem:[#allocation4 + $0x18] sm:$0xf] %vm801_vm10, %v790_v60 }
 0x138   : > { %809 = vst.msk [vmem:[#allocation4 + $0x1c] sm:$0xf] %vm801_vm10, %v792_v57  ;;  %vm1707_vm10 = vcmask 1043456  }
 0x139   : > { %v1194_v39 = vpop.permute.xlu2 %1193 }
 0x13a   : > { %1218 = vst.msk [vmem:[#allocation5] sm:$0xf] %vm1217_vm3, %v1194_v39 }
 0x13d   : > { %v855_v62 = vpop.permute.xlu0 %854  ;;  %v857_v63 = vpop.permute.xlu1 %856 }
 0x13e   : > { %873 = vst.msk [vmem:[#allocation4 + $0x18] sm:$0xf] %vm866_vm11, %v855_v62 }
 0x13f   : > { %874 = vst.msk [vmem:[#allocation4 + $0x1c] sm:$0xf] %vm866_vm11, %v857_v63  ;;  %vm1560_vm11 = vcmask 519616  }
 0x140   : > { %938 = vst.msk [vmem:[#allocation4 + $0x18] sm:$0xf] %vm931_vm12, %v920_v61 }
 0x145   : > { %v922_v1 = vpop.permute.xlu0 %921  ;;  %v1251_v46 = vpop.permute.xlu1 %1250 }
 0x146   : > { %939 = vst.msk [vmem:[#allocation4 + $0x1c] sm:$0xf] %vm931_vm12, %v922_v1  ;;  %vm1617_vm12 = vcmask 585216  }
 0x147   : > { %1275 = vst.msk [vmem:[#allocation5] sm:$0xf] %vm1274_vm4, %v1251_v46  ;;  %v1046_v46 = vld [vmem:[#allocation2 + $0x19] ss:$2 sm:$0xff] }
 0x14c   : > { %v1018_v5 = vpop.f32.mrf.mxu0 }
 0x14d   : > { %v1994_v6 = vld [vmem:[#allocation4 + $0x18] sm:$0xff]  ;;  %v1019_v7 = vadd.f32 %v2540_v2, %v1018_v5  ;;  %v2606_v3 = vpop.permute.xlu0 %1493 }
 0x14e   : > { %1945 = vmatmul.msk.bf16.gmra.mxu0 %vm992_vm13, %v1994_v6 }
 0x14f   : > { %v1038_v0 = vmax.f32 %v1019_v7, 0.0 }
 0x151   : > { %1136 = vst.msk [vmem:[#allocation3 + $0x11] sm:$0xff] %vm1107_vm15, %v1038_v0 }
 0x154   : > { %v1020_v8 = vpop.f32.mrf.mxu0 }
 0x155   : > { %v1021_v9 = vadd.f32 %v2540_v2, %v1020_v8 }
 0x157   : > { %v1039_v10 = vmax.f32 %v1021_v9, 0.0 }
 0x158   : > { %v1397_v11 = vld [vmem:[#allocation3 + $0x12] sm:$0xff] }
 0x159   : > { %v1170_v12 = vld [vmem:[#allocation3 + $0x11] sm:$0xff]  ;;  %1137 = vst.msk [vmem:[#allocation3 + $0x21] sm:$0xff] %vm1107_vm15, %v1039_v10  ;;  %v1405_v14 = vpack.c.bf16 %v1397_v11, %v1397_v11 }
 0x15a   : > { %v1283_v13 = vld [vmem:[#allocation3 + $0x10] sm:$0xff]  ;;  %v1178_v15 = vpack.c.bf16 %v1170_v12, %v1170_v12 }
 0x15b   : > { %v1291_v16 = vpack.c.bf16 %v1283_v13, %v1283_v13  ;;  %1421 = vrot.lane.b32.xlu1 %v1405_v14, %s2139_s23  ;;  %1252 = vrot.lane.b32.xlu2 %v1405_v14, %s2133_s21 }
 0x15c   : > { %1195 = vrot.lane.b32.xlu0 %v1178_v15, %s2131_s14 }
 0x15d   : > { %1162 = vst.msk [vmem:[#allocation5 + $0x4] sm:$0xf] %vm1160_vm2, %v1291_v16 }
 0x160   : > { %v1171_v17 = vld [vmem:[#allocation3 + $0x21] sm:$0xff] }
 0x161   : > { %v1455_v18 = vld [vmem:[#allocation3 + $0x20] sm:$0xff]  ;;  %v1179_v19 = vpack.c.bf16 %v1171_v17, %v1171_v17 }
 0x162   : > { %v1463_v20 = vpack.c.bf16 %v1455_v18, %v1455_v18  ;;  %v1398_v21 = vld [vmem:[#allocation3 + $0x22] sm:$0xff] }
 0x163   : > { %1197 = vrot.lane.b32.xlu1 %v1179_v19, %s2131_s14  ;;  %1307 = vrot.lane.b32.xlu2 %v1291_v16, %s2134_s22  ;;  %v1406_v22 = vpack.c.bf16 %v1398_v21, %v1398_v21 }
 0x164   : > { %1163 = vst.msk [vmem:[#allocation5 + $0x8] sm:$0xf] %vm1160_vm2, %v1463_v20  ;;  %1364 = vrot.lane.b32.xlu0 %v1178_v15, %s2137_s8 }
 0x16b   : > { %1366 = vrot.lane.b32.xlu1 %v1179_v19, %s2137_s8  ;;  %1423 = vrot.lane.b32.xlu2 %v1406_v22, %s2139_s23 }
 0x16c   : > { %1254 = vrot.lane.b32.xlu0 %v1406_v22, %s2133_s21 }
 0x173   : > { %1593 = vrot.lane.b32.xlu1 %v1406_v22, %s2140_s29  ;;  %1479 = vrot.lane.b32.xlu2 %v1463_v20, %s2138_s20 }
 0x174   : > { %1309 = vrot.lane.b32.xlu0 %v1463_v20, %s2134_s22  ;;  %v1023_v23 = vpop.f32.mrf.mxu0 }
 0x175   : > { %v1024_v24 = vadd.f32 %v2540_v2, %v1023_v23 }
 0x177   : > { %v1040_v25 = vmax.f32 %v1024_v24, 0.0 }
 0x179   : > { %1138 = vst.msk [vmem:[#allocation3 + $0x31] sm:$0xff] %vm1107_vm15, %v1040_v25 }
 0x17c   : > { %1536 = vrot.lane.b32.xlu0 %v1179_v19, %s2141_s15  ;;  %v1025_v26 = vpop.f32.mrf.mxu0 }
 0x17d   : > { %v1026_v27 = vadd.f32 %v2540_v2, %v1025_v26  ;;  %v2004_v26 = vld [vmem:[%s2767_s3 + $0x18] sm:$0xff] }
 0x17f   : > { %v1041_v28 = vmax.f32 %v1026_v27, 0.0 }
 0x180   : > { %v1399_v29 = vld [vmem:[#allocation3 + $0x32] sm:$0xff] }
 0x181   : > { %v1172_v30 = vld [vmem:[#allocation3 + $0x31] sm:$0xff]  ;;  %1139 = vst.msk [vmem:[#allocation3 + $0x41] sm:$0xff] %vm1107_vm15, %v1041_v28  ;;  %v1407_v32 = vpack.c.bf16 %v1399_v29, %v1399_v29  ;;  %v2003_v29 = vld [vmem:[%s2767_s3 + $0x10] sm:$0xff] }
 0x182   : > { %v1456_v31 = vld [vmem:[#allocation3 + $0x30] sm:$0xff]  ;;  %v1180_v33 = vpack.c.bf16 %v1172_v30, %v1172_v30 }
 0x183   : > { %v1464_v34 = vpack.c.bf16 %v1456_v31, %v1456_v31  ;;  %1256 = vrot.lane.b32.xlu1 %v1407_v32, %s2133_s21 }
 0x184   : > { %1199 = vrot.lane.b32.xlu2 %v1180_v33, %s2131_s14  ;;  %1425 = vrot.lane.b32.xlu0 %v1407_v32, %s2139_s23 }
 0x185   : > { %1164 = vst.msk [vmem:[#allocation5 + $0xc] sm:$0xf] %vm1160_vm2, %v1464_v34 }
 0x188   : > { %v1286_v35 = vld [vmem:[#allocation3 + $0x40] sm:$0xff] }
 0x189   : > { %v1294_v36 = vpack.c.bf16 %v1286_v35, %v1286_v35  ;;  %v1571_v40 = vld [vmem:[#allocation3 + $0x42] sm:$0xff] }
 0x18a   : > { %v1343_v41 = vld [vmem:[#allocation3 + $0x41] sm:$0xff]  ;;  %v1579_v42 = vpack.c.bf16 %v1571_v40, %v1571_v40 }
 0x18b   : > { %1368 = vrot.lane.b32.xlu1 %v1180_v33, %s2137_s8  ;;  %1165 = vst.msk [vmem:[#allocation5 + $0x10] sm:$0xf] %vm1160_vm2, %v1294_v36  ;;  %v1351_v43 = vpack.c.bf16 %v1343_v41, %v1343_v41 }
 0x18c   : > { %1311 = vrot.lane.b32.xlu2 %v1464_v34, %s2134_s22  ;;  %1481 = vrot.lane.b32.xlu0 %v1464_v34, %s2138_s20 }
 0x193   : > { %1538 = vrot.lane.b32.xlu1 %v1180_v33, %s2141_s15 }
 0x194   : > { %1595 = vrot.lane.b32.xlu2 %v1407_v32, %s2140_s29  ;;  %1313 = vrot.lane.b32.xlu0 %v1294_v36, %s2134_s22  ;;  %v2002_v32 = vld [vmem:[%s2767_s3 + $0x8] sm:$0xff] }
 0x19b   : > { %1427 = vrot.lane.b32.xlu1 %v1579_v42, %s2139_s23 }
 0x19c   : > { %1370 = vrot.lane.b32.xlu2 %v1351_v43, %s2137_s8  ;;  %1597 = vrot.lane.b32.xlu0 %v1579_v42, %s2140_s29 }
 0x19d   : > { %v1028_v44 = vpop.f32.mrf.mxu0 }
 0x19e   : > { %v1029_v45 = vadd.f32 %v2540_v2, %v1028_v44 }
 0x1a0   : > { %v1042_v47 = vmax.f32 %v1029_v45, 0.0 }
 0x1a2   : > { %1140 = vst.msk [vmem:[#allocation3 + $0x51] sm:$0xff] %vm1107_vm15, %v1042_v47  ;;  %v1047_v47 = vld [vmem:[#allocation2 + $0x49] ss:$2 sm:$0xff] }
 0x1a3   : > { %1540 = vrot.lane.b32.xlu1 %v1351_v43, %s2141_s15 }
 0x1a4   : > { %1483 = vrot.lane.b32.xlu2 %v1294_v36, %s2138_s20  ;;  %1201 = vrot.lane.b32.xlu0 %v1351_v43, %s2131_s14 }
 0x1a5   : > { %v1030_v48 = vpop.f32.mrf.mxu0 }
 0x1a6   : > { %v1031_v49 = vadd.f32 %v2540_v2, %v1030_v48 }
 0x1a8   : > { %v1043_v50 = vmax.f32 %v1031_v49, 0.0  ;;  %v1054_v49 = vpack.c.bf16 %v1047_v47, %v1046_v46  ;;  %v2063_v47 = vld [vmem:[%s2770_s6] ss:$0 sm:$0xff] }
 0x1a9   : > { %v1515_v51 = vld [vmem:[#allocation3 + $0x51] sm:$0xff] }
 0x1aa   : > { %v1458_v52 = vld [vmem:[#allocation3 + $0x50] sm:$0xff]  ;;  %1141 = vst.msk [vmem:[#allocation3 + $0x61] sm:$0xff] %vm1107_vm15, %v1043_v50  ;;  %v1523_v53 = vpack.c.bf16 %v1515_v51, %v1515_v51 }
 0x1ab   : > { %v1466_v54 = vpack.c.bf16 %v1458_v52, %v1458_v52  ;;  %1258 = vrot.lane.b32.xlu1 %v1579_v42, %s2133_s21  ;;  %v1572_v55 = vld [vmem:[#allocation3 + $0x52] sm:$0xff]  ;;  %v1058_v42 = vld [vmem:[%s2769_s5] sm:$0x3] }
 0x1ac   : > { %1542 = vrot.lane.b32.xlu2 %v1523_v53, %s2141_s15  ;;  %v1580_v56 = vpack.c.bf16 %v1572_v55, %v1572_v55  ;;  %v1076_v43 = vsel %vm1005_vm7, %v1058_v42, 0  ;;  %v1519_v50 = vld [vmem:[#allocation3 + $0x91] sm:$0xff]  ;;  %vm1694_vm7 = vcmask 588800  }
 0x1ad   : > { %1485 = vrot.lane.b32.xlu0 %v1466_v54, %s2138_s20  ;;  %1166 = vst.msk [vmem:[#allocation5 + $0x14] sm:$0xf] %vm1160_vm2, %v1466_v54  ;;  %1085 = vmatpush.bf16.msra.mxu1 %v1076_v43  ;;  %v1527_v51 = vpack.c.bf16 %v1519_v50, %v1519_v50  ;;  %v1576_v52 = vld [vmem:[#allocation3 + $0x92] sm:$0xff] }
 0x1b0   : > { %1946 = vmatmul.msk.bf16.vlgmr.msra.gmra.mxu1 %vm278_vm0, %v1054_v49 }
 0x1b1   : > { %v1288_v57 = vld [vmem:[#allocation3 + $0x60] sm:$0xff] }
 0x1b2   : > { %v1296_v58 = vpack.c.bf16 %v1288_v57, %v1288_v57  ;;  %v1516_v61 = vld [vmem:[#allocation3 + $0x61] sm:$0xff] }
 0x1b3   : > { %1599 = vrot.lane.b32.xlu1 %v1580_v56, %s2140_s29  ;;  %v1402_v62 = vld [vmem:[#allocation3 + $0x62] sm:$0xff]  ;;  %v1524_v63 = vpack.c.bf16 %v1516_v61, %v1516_v61 }
 0x1b4   : > { %1260 = vrot.lane.b32.xlu2 %v1580_v56, %s2133_s21  ;;  %1167 = vst.msk [vmem:[#allocation5 + $0x18] sm:$0xf] %vm1160_vm2, %v1296_v58  ;;  %v1410_v1 = vpack.c.bf16 %v1402_v62, %v1402_v62 }
 0x1b5   : > { %1372 = vrot.lane.b32.xlu0 %v1523_v53, %s2137_s8  ;;  %v1253_v59 = vpop.permute.xlu2 %1252 }
 0x1bb   : > { %1203 = vrot.lane.b32.xlu1 %v1523_v53, %s2131_s14 }
 0x1bc   : > { %1315 = vrot.lane.b32.xlu2 %v1466_v54, %s2134_s22 }
 0x1bd   : > { %1317 = vrot.lane.b32.xlu0 %v1296_v58, %s2134_s22  ;;  %v1308_v60 = vpop.permute.xlu2 %1307 }
 0x1be   : > { %1332 = vst.msk [vmem:[#allocation5] sm:$0xf] %vm1331_vm5, %v1308_v60 }
 0x1c3   : > { %1429 = vrot.lane.b32.xlu1 %v1580_v56, %s2139_s23  ;;  %v1584_v56 = vpack.c.bf16 %v1576_v52, %v1576_v52 }
 0x1c4   : > { %1431 = vrot.lane.b32.xlu2 %v1410_v1, %s2139_s23 }
 0x1c5   : > { %1544 = vrot.lane.b32.xlu0 %v1524_v63, %s2141_s15  ;;  %v2608_v4 = vpop.permute.xlu2 %1423 }
 0x1cb   : > { %1374 = vrot.lane.b32.xlu1 %v1524_v63, %s2137_s8  ;;  %v1033_v5 = vpop.f32.mrf.mxu0 }
 0x1cc   : > { %1487 = vrot.lane.b32.xlu2 %v1296_v58, %s2138_s20  ;;  %v1034_v6 = vadd.f32 %v2540_v2, %v1033_v5 }
 0x1cd   : > { %1262 = vrot.lane.b32.xlu0 %v1410_v1, %s2133_s21  ;;  %v1422_v7 = vpop.permute.xlu1 %1421  ;;  %v1480_v11 = vpop.permute.xlu2 %1479 }
 0x1ce   : > { %v1044_v0 = vmax.f32 %v1034_v6, 0.0  ;;  %v1196_v8 = vpop.permute.xlu0 %1195 }
 0x1cf   : > { %1219 = vst.msk [vmem:[#allocation5 + $0x4] sm:$0xf] %vm1217_vm3, %v1196_v8 }
 0x1d0   : > { %1142 = vst.msk [vmem:[#allocation3 + $0x71] sm:$0xff] %vm1107_vm15, %v1044_v0 }
 0x1d1   : > { %1276 = vst.msk [vmem:[#allocation5 + $0x4] sm:$0xf] %vm1274_vm4, %v1253_v59 }
 0x1d3   : > { %1205 = vrot.lane.b32.xlu1 %v1524_v63, %s2131_s14  ;;  %v1035_v9 = vpop.f32.mrf.mxu0 }
 0x1d4   : > { %1601 = vrot.lane.b32.xlu2 %v1410_v1, %s2140_s29  ;;  %v1036_v10 = vadd.f32 %v2540_v2, %v1035_v9  ;;  %v1642_v2 = vld [vmem:[%s2767_s3 + $0x20] sm:$0xf] }
 0x1d5   : > { %v1198_v12 = vpop.permute.xlu1 %1197  ;;  %v1684_v19 = vunpack.c.l.b16 %v1642_v2  ;;  %v1048_v1 = vld [vmem:[#allocation2 + $0x79] ss:$2 sm:$0xff] }
 0x1d6   : > { %v1045_v13 = vmax.f32 %v1036_v10, 0.0  ;;  %1220 = vst.msk [vmem:[#allocation5 + $0x8] sm:$0xf] %vm1217_vm3, %v1198_v12  ;;  %v1365_v14 = vpop.permute.xlu0 %1364 }
 0x1d7   : > { %1389 = vst.msk [vmem:[#allocation5] sm:$0xf] %vm1388_vm6, %v1365_v14  ;;  %v1517_v15 = vld [vmem:[#allocation3 + $0x71] sm:$0xff]  ;;  %v1689_v20 = vpack.c.b16 %v1684_v19, %v1684_v19 }
 0x1d8   : > { %v1460_v16 = vld [vmem:[#allocation3 + $0x70] sm:$0xff]  ;;  %1143 = vst.msk [vmem:[#allocation3 + $0x81] sm:$0xff] %vm1107_vm15, %v1045_v13  ;;  %v1525_v17 = vpack.c.bf16 %v1517_v15, %v1517_v15 }
 0x1d9   : > { %v1468_v18 = vpack.c.bf16 %v1460_v16, %v1460_v16  ;;  %1446 = vst.msk [vmem:[#allocation5] sm:$0xf] %vm1445_vm8, %v1422_v7  ;;  %v1574_v22 = vld [vmem:[#allocation3 + $0x72] sm:$0xff]  ;;  %v1709_v24 = vsel %vm1707_vm10, %v1689_v20, 0 }
 0x1da   : > { %1504 = vst.msk [vmem:[#allocation5] sm:$0xf] %vm1503_vm9, %v1480_v11  ;;  %1714 = vmatpush.bf16.msra.mxu2 %v1709_v24  ;;  %2005 = vmatpush.bf16.msra.mxu3 %v1709_v24  ;;  %v1582_v25 = vpack.c.bf16 %v1574_v22, %v1574_v22  ;;  %v1051_v24 = vld [vmem:[#allocation2 + $0x109] ss:$2 sm:$0xff] }
 0x1db   : > { %1489 = vrot.lane.b32.xlu0 %v1468_v18, %s2138_s20  ;;  %1546 = vrot.lane.b32.xlu1 %v1525_v17, %s2141_s15  ;;  %1168 = vst.msk [vmem:[#allocation5 + $0x1c] sm:$0xf] %vm1160_vm2, %v1468_v18 }
 0x1dc   : > { %1207 = vrot.lane.b32.xlu2 %v1525_v17, %s2131_s14  ;;  %s1987_s14 = sshll.u32 %s2203_s28, 3 }
 0x1dd   : > { %v1367_v27 = vpop.permute.xlu1 %1366  ;;  %s1801_s19 = scalar_lea.hbm %s2771_s7, %s1987_s14 }
 0x1de   : > { %v1200_v21 = vpop.permute.xlu2 %1199  ;;  %v1255_v23 = vpop.permute.xlu0 %1254  ;;  %1715 = vmatpush.bf16.msra.mxu2 %v2004_v26  ;;  %2006 = vmatpush.bf16.msra.mxu3 %v2004_v26 }
 0x1df   : > { %1221 = vst.msk [vmem:[#allocation5 + $0xc] sm:$0xf] %vm1217_vm3, %v1200_v21  ;;  %v1347_v31 = vld [vmem:[#allocation3 + $0x81] sm:$0xff] }
 0x1e0   : > { %1277 = vst.msk [vmem:[#allocation5 + $0x8] sm:$0xf] %vm1274_vm4, %v1255_v23  ;;  %v1355_v33 = vpack.c.bf16 %v1347_v31, %v1347_v31  ;;  %v1290_v36 = vld [vmem:[#allocation3 + $0x80] sm:$0xff]  ;;  %v1050_v23 = vld [vmem:[#allocation2 + $0xd9] ss:$2 sm:$0xff] }
 0x1e1   : > { %v1404_v39 = vld [vmem:[#allocation3 + $0x82] sm:$0xff]  ;;  %v1298_v40 = vpack.c.bf16 %v1290_v36, %v1290_v36 }
 0x1e2   : > { %1716 = vmatpush.bf16.msra.mxu2 %v2003_v29  ;;  %2007 = vmatpush.bf16.msra.mxu3 %v2003_v29  ;;  %v1412_v41 = vpack.c.bf16 %v1404_v39, %v1404_v39 }
 0x1e3   : > { %1603 = vrot.lane.b32.xlu0 %v1582_v25, %s2140_s29  ;;  %1264 = vrot.lane.b32.xlu1 %v1582_v25, %s2133_s21 }
 0x1e4   : > { %1319 = vrot.lane.b32.xlu2 %v1468_v18, %s2134_s22 }
 0x1e5   : > { %v1594_v34 = vpop.permute.xlu1 %1593 }
 0x1e6   : > { %v1312_v28 = vpop.permute.xlu2 %1311  ;;  %v1310_v30 = vpop.permute.xlu0 %1309  ;;  %1717 = vmatpush.bf16.msra.mxu2 %v2002_v32  ;;  %2008 = vmatpush.bf16.msra.mxu3 %v2002_v32  ;;  %v1052_v32 = vld [vmem:[#allocation2 + $0x139] ss:$2 sm:$0xff] }
 0x1e7   : > { %1334 = vst.msk [vmem:[#allocation5 + $0x8] sm:$0xf] %vm1331_vm5, %v1312_v28 }
 0x1e8   : > { %1333 = vst.msk [vmem:[#allocation5 + $0x4] sm:$0xf] %vm1331_vm5, %v1310_v30 }
 0x1e9   : > { %1390 = vst.msk [vmem:[#allocation5 + $0x4] sm:$0xf] %vm1388_vm6, %v1367_v27 }
 0x1ea   : > { %1447 = vst.msk [vmem:[#allocation5 + $0x4] sm:$0xf] %vm1445_vm8, %v2608_v4  ;;  %1718 = vmatpush.bf16.msra.mxu2 %v2001_v37  ;;  %2009 = vmatpush.bf16.msra.mxu3 %v2001_v37  ;;  %v1049_v4 = vld [vmem:[#allocation2 + $0xa9] ss:$2 sm:$0xff] }
 0x1eb   : > { %1433 = vrot.lane.b32.xlu0 %v1582_v25, %s2139_s23  ;;  %1376 = vrot.lane.b32.xlu1 %v1525_v17, %s2137_s8  ;;  %v1055_v6 = vpack.c.bf16 %v1049_v4, %v1048_v1  ;;  %v1056_v25 = vpack.c.bf16 %v1051_v24, %v1050_v23 }
 0x1ec   : > { %1378 = vrot.lane.b32.xlu2 %v1355_v33, %s2137_s8  ;;  %s1805_s8 = sshll.u32 %s1801_s19, 4  ;;  %s1806_s8 = int_to_ptr.hbm [resolvable:$true] %s1805_s8 }
 0x1ed   : > { %1947 = vmatmul.msk.bf16.gmra.mxu1 %vm278_vm0, %v1055_v6 }
 0x1ee   : > { %v1596_v35 = vpop.permute.xlu2 %1595  ;;  %v1537_v38 = vpop.permute.xlu0 %1536 }
 0x1ef   : > { %1561 = vst.msk [vmem:[#allocation5] sm:$0xf] %vm1560_vm11, %v1537_v38 }
 0x1f0   : > { %1618 = vst.msk [vmem:[#allocation5] sm:$0xf] %vm1617_vm12, %v1594_v34 }
 0x1f3   : > { %1321 = vrot.lane.b32.xlu0 %v1298_v40, %s2134_s22  ;;  %1435 = vrot.lane.b32.xlu1 %v1412_v41, %s2139_s23  ;;  %s2079_s22 = sshra.s32 %s1806_s8, 4  ;;  %s2080_s22 = int_to_ptr.hbm [resolvable:$true] %s2079_s22 }
 0x1f4   : > { %1491 = vrot.lane.b32.xlu2 %v1298_v40, %s2138_s20  ;;  %s2081_s20 = scalar_lea.hbm %s2080_s22, 8  ;;  %p2086_p0 = scmp.lt.s32.totalorder %s2080_s22, %s2771_s7 }
 0x1f5   : > { %v1257_v44 = vpop.permute.xlu1 %1256  ;;  %p2082_p11 = scmp.ne.s32.totalorder %s2080_s22, %s2081_s20 }
 0x1f6   : > { %v1371_v45 = vpop.permute.xlu2 %1370  ;;  %v1426_v48 = vpop.permute.xlu0 %1425  ;;  %1278 = vst.msk [vmem:[#allocation5 + $0xc] sm:$0xf] %vm1274_vm4, %v1257_v44 }
 0x1f7   : > { %p2083_p12 = pnand %p2082_p11, %p2220_p5 }
 0x1f9   : > { %p2084_p13 = pneg %p2083_p12 }
 0x1fb   : > { %1605 = vrot.lane.b32.xlu0 %v1412_v41, %s2140_s29  ;;  %1548 = vrot.lane.b32.xlu1 %v1355_v33, %s2141_s15  ;;  %v1053_v33 = vld [vmem:[#allocation2 + $0x169] ss:$2 sm:$0xff] }
 0x1fc   : > { %1550 = vrot.lane.b32.xlu2 %v1527_v51, %s2141_s15  ;;  %v1057_v34 = vpack.c.bf16 %v1053_v33, %v1052_v32  ;;  %s269_s15 = sand.u32 1, %s2119_s25  }
 0x1fd   : > { %v1369_v53 = vpop.permute.xlu1 %1368  ;;  %1948 = vmatmul.msk.bf16.gmra.mxu1 %vm278_vm0, %v1056_v25  ;;  %s1915_s9 = sshll.u32 %s269_s15, 3  ;;  %s1791_s18 = scalar_lea.sflag [#allocation7], %s269_s15 }
 0x1fe   : > { %v1484_v54 = vpop.permute.xlu2 %1483  ;;  %v1482_v55 = vpop.permute.xlu0 %1481  ;;  %1391 = vst.msk [vmem:[#allocation5 + $0x8] sm:$0xf] %vm1388_vm6, %v1369_v53  ;;  %s271_s16 = scalar_lea.vmem [#allocation6], %s1915_s9 }
 0x1ff   : > { %1505 = vst.msk [vmem:[#allocation5 + $0x4] sm:$0xf] %vm1503_vm9, %v1482_v55  ;;  %s1803_s17 = sshll.u32 %s271_s16, 4  ;;  %s1804_s17 = int_to_ptr.vmem [resolvable:$true] %s1803_s17 }
 0x200   : > { %1448 = vst.msk [vmem:[#allocation5 + $0x8] sm:$0xf] %vm1445_vm8, %v1426_v48 }
 0x201   : > { %1506 = vst.msk [vmem:[#allocation5 + $0x8] sm:$0xf] %vm1503_vm9, %v1484_v54 }
 0x203   : > { %1607 = vrot.lane.b32.xlu1 %v1584_v56, %s2140_s29  ;;  %s2085_s29 = scalar_lea.hbm %s2771_s7, 16 }
 0x204   : > { %p2087_p1 = scmp.lt.s32.totalorder %s2085_s29, %s2081_s20 }
 0x205   : > { %v1539_v57 = vpop.permute.xlu1 %1538 }
 0x206   : > { %v1314_v58 = vpop.permute.xlu0 %1313  ;;  %1562 = vst.msk [vmem:[#allocation5 + $0x4] sm:$0xf] %vm1560_vm11, %v1539_v57  ;;  %v1543_v59 = vpop.permute.xlu2 %1542  ;;  %p2088_p2 = por %p2087_p1, %p2086_p0 }
 0x207   : > { %1335 = vst.msk [vmem:[#allocation5 + $0xc] sm:$0xf] %vm1331_vm5, %v1314_v58 }
 0x208   : > { %1392 = vst.msk [vmem:[#allocation5 + $0xc] sm:$0xf] %vm1388_vm6, %v1371_v45  ;;  %p2089_p3 = pnand %p2088_p2, %p2084_p13 }
 0x209   : > { %1619 = vst.msk [vmem:[#allocation5 + $0x4] sm:$0xf] %vm1617_vm12, %v1596_v35 }
 0x20d   : > { %v1428_v60 = vpop.permute.xlu1 %1427  ;;  %1949 = vmatmul.msk.bf16.gmra.mxu1 %vm278_vm0, %v1057_v34  ;;  %vm1788_vm0 = vcmask 523264  }
 0x20e   : > { %v1598_v61 = vpop.permute.xlu0 %1597  ;;  %1449 = vst.msk [vmem:[#allocation5 + $0xc] sm:$0xf] %vm1445_vm8, %v1428_v60  ;;  %v1261_v62 = vpop.permute.xlu2 %1260 }
 0x210   : > { %v1997_v63 = vld [vmem:[#allocation5] sm:$0xff] }
 0x211   : > { %1982 = vmatmul.msk.bf16.vlgmr.msra.gmra.mxu2 %vm1694_vm7, %v1997_v63 }
 0x215   : > { %v1541_v5 = vpop.permute.xlu1 %1540 }
 0x216   : > { %v1202_v7 = vpop.permute.xlu0 %1201  ;;  %1563 = vst.msk [vmem:[#allocation5 + $0x8] sm:$0xf] %vm1560_vm11, %v1541_v5  ;;  %v1316_v0 = vpop.permute.xlu2 %1315 }
 0x217   : > { %1222 = vst.msk [vmem:[#allocation5 + $0x10] sm:$0xf] %vm1217_vm3, %v1202_v7 }
 0x218   : > { %1620 = vst.msk [vmem:[#allocation5 + $0x8] sm:$0xf] %vm1617_vm12, %v1598_v61 }
 0x21d   : > { %v1259_v8 = vpop.permute.xlu1 %1258 }
 0x21e   : > { %1279 = vst.msk [vmem:[#allocation5 + $0x10] sm:$0xf] %vm1274_vm4, %v1259_v8  ;;  %v1432_v10 = vpop.permute.xlu2 %1431 }
 0x21f   : > { %v1486_v9 = vpop.permute.xlu0 %1485  ;;  %1336 = vst.msk [vmem:[#allocation5 + $0x10] sm:$0xf] %vm1331_vm5, %v1316_v0 }
 0x220   : > { %1507 = vst.msk [vmem:[#allocation5 + $0xc] sm:$0xf] %vm1503_vm9, %v1486_v9 }
 0x221   : > { %1564 = vst.msk [vmem:[#allocation5 + $0xc] sm:$0xf] %vm1560_vm11, %v1543_v59 }
 0x225   : > { %v1600_v11 = vpop.permute.xlu1 %1599 }
 0x226   : > { %1621 = vst.msk [vmem:[#allocation5 + $0xc] sm:$0xf] %vm1617_vm12, %v1600_v11  ;;  %v1488_v13 = vpop.permute.xlu2 %1487 }
 0x227   : > { %v1373_v12 = vpop.permute.xlu0 %1372 }
 0x228   : > { %1393 = vst.msk [vmem:[#allocation5 + $0x10] sm:$0xf] %vm1388_vm6, %v1373_v12 }
 0x22d   : > { %v1204_v14 = vpop.permute.xlu1 %1203  ;;  %v1998_v15 = vld [vmem:[#allocation5 + $0x8] sm:$0xff]  ;;  %v1087_v46 = vpop.f32.mrf.mxu1 }
 0x22e   : > { %1223 = vst.msk [vmem:[#allocation5 + $0x14] sm:$0xf] %vm1217_vm3, %v1204_v14  ;;  %v1602_v17 = vpop.permute.xlu2 %1601  ;;  %1983 = vmatmul.msk.bf16.vlgmr.msra.gmra.mxu3 %vm1694_vm7, %v1998_v15  ;;  %v1088_v48 = vadd.f32 %v2063_v47, %v1087_v46 }
 0x22f   : > { %v1318_v16 = vpop.permute.xlu0 %1317  ;;  %1280 = vst.msk [vmem:[#allocation5 + $0x14] sm:$0xf] %vm1274_vm4, %v1261_v62 }
 0x230   : > { %1337 = vst.msk [vmem:[#allocation5 + $0x14] sm:$0xf] %vm1331_vm5, %v1318_v16 }
 0x235   : > { %v1430_v18 = vpop.permute.xlu1 %1429  ;;  %v1089_v52 = vpop.f32.mrf.mxu1 }
 0x236   : > { %1450 = vst.msk [vmem:[#allocation5 + $0x10] sm:$0xf] %vm1445_vm8, %v1430_v18  ;;  %v1208_v19 = vpop.permute.xlu2 %1207  ;;  %v1090_v54 = vadd.f32 %v2063_v47, %v1089_v52 }
 0x237   : > { %v1545_v2 = vpop.permute.xlu0 %1544  ;;  %1508 = vst.msk [vmem:[#allocation5 + $0x10] sm:$0xf] %vm1503_vm9, %v1488_v13 }
 0x238   : > { %1565 = vst.msk [vmem:[#allocation5 + $0x10] sm:$0xf] %vm1560_vm11, %v1545_v2 }
 0x239   : > { %1622 = vst.msk [vmem:[#allocation5 + $0x10] sm:$0xf] %vm1617_vm12, %v1602_v17 }
 0x23a   : > { %1225 = vst.msk [vmem:[#allocation5 + $0x1c] sm:$0xf] %vm1217_vm3, %v1208_v19 }
 0x23d   : > { %v1375_v20 = vpop.permute.xlu1 %1374 }
 0x23e   : > { %1394 = vst.msk [vmem:[#allocation5 + $0x14] sm:$0xf] %vm1388_vm6, %v1375_v20  ;;  %v1320_v26 = vpop.permute.xlu2 %1319 }
 0x23f   : > { %1451 = vst.msk [vmem:[#allocation5 + $0x14] sm:$0xf] %vm1445_vm8, %v1432_v10  ;;  %v1263_v21 = vpop.permute.xlu0 %1262 }
 0x245   : > { %v1206_v22 = vpop.permute.xlu1 %1205 }
 0x246   : > { %1224 = vst.msk [vmem:[#allocation5 + $0x18] sm:$0xf] %vm1217_vm3, %v1206_v22  ;;  %v1379_v29 = vpop.permute.xlu2 %1378 }
 0x247   : > { %1281 = vst.msk [vmem:[#allocation5 + $0x18] sm:$0xf] %vm1274_vm4, %v1263_v21 }
 0x248   : > { %1338 = vst.msk [vmem:[#allocation5 + $0x18] sm:$0xf] %vm1331_vm5, %v1320_v26 }
 0x24d   : > { %v1490_v27 = vpop.permute.xlu0 %1489  ;;  %v1547_v28 = vpop.permute.xlu1 %1546 }
 0x24e   : > { %1509 = vst.msk [vmem:[#allocation5 + $0x14] sm:$0xf] %vm1503_vm9, %v1490_v27  ;;  %v1492_v38 = vpop.permute.xlu2 %1491 }
 0x24f   : > { %1566 = vst.msk [vmem:[#allocation5 + $0x14] sm:$0xf] %vm1560_vm11, %v1547_v28 }
 0x255   : > { %v1604_v30 = vpop.permute.xlu0 %1603  ;;  %v1265_v31 = vpop.permute.xlu1 %1264 }
 0x256   : > { %1623 = vst.msk [vmem:[#allocation5 + $0x14] sm:$0xf] %vm1617_vm12, %v1604_v30  ;;  %v1551_v41 = vpop.permute.xlu2 %1550 }
 0x257   : > { %1282 = vst.msk [vmem:[#allocation5 + $0x1c] sm:$0xf] %vm1274_vm4, %v1265_v31 }
 0x25d   : > { %v1434_v35 = vpop.permute.xlu0 %1433  ;;  %v1999_v36 = vld [vmem:[#allocation5 + $0x10] sm:$0xff]  ;;  %v1377_v37 = vpop.permute.xlu1 %1376 }
 0x25e   : > { %1395 = vst.msk [vmem:[#allocation5 + $0x18] sm:$0xf] %vm1388_vm6, %v1377_v37  ;;  %1984 = vmatmul.msk.bf16.gmra.mxu3 %vm1694_vm7, %v1999_v36 }
 0x25f   : > { %1452 = vst.msk [vmem:[#allocation5 + $0x18] sm:$0xf] %vm1445_vm8, %v1434_v35 }
 0x260   : > { %1510 = vst.msk [vmem:[#allocation5 + $0x18] sm:$0xf] %vm1503_vm9, %v1492_v38 }
 0x265   : > { %v1322_v39 = vpop.permute.xlu0 %1321  ;;  %v1436_v40 = vpop.permute.xlu1 %1435 }
 0x266   : > { %1339 = vst.msk [vmem:[#allocation5 + $0x1c] sm:$0xf] %vm1331_vm5, %v1322_v39 }
 0x267   : > { %1396 = vst.msk [vmem:[#allocation5 + $0x1c] sm:$0xf] %vm1388_vm6, %v1379_v29 }
 0x268   : > { %1453 = vst.msk [vmem:[#allocation5 + $0x1c] sm:$0xf] %vm1445_vm8, %v1436_v40 }
 0x269   : > { %1511 = vst.msk [vmem:[#allocation5 + $0x1c] sm:$0xf] %vm1503_vm9, %v2606_v3  ;;  %v2064_v3 = vld [vmem:[%s2768_s4] ss:$0 sm:$0xff] }
 0x26a   : > { %1568 = vst.msk [vmem:[#allocation5 + $0x1c] sm:$0xf] %vm1560_vm11, %v1551_v41  ;;  %v1092_v59 = vpop.f32.mrf.mxu1 }
 0x26b   : > { %v1093_v60 = vadd.f32 %v2063_v47, %v1092_v59 }
 0x26d   : > { %v1606_v42 = vpop.permute.xlu0 %1605  ;;  %v1549_v43 = vpop.permute.xlu1 %1548 }
 0x26e   : > { %1567 = vst.msk [vmem:[#allocation5 + $0x18] sm:$0xf] %vm1560_vm11, %v1549_v43 }
 0x26f   : > { %1624 = vst.msk [vmem:[#allocation5 + $0x18] sm:$0xf] %vm1617_vm12, %v1606_v42 }
 0x272   : > { %v1094_v1 = vpop.f32.mrf.mxu1 }
 0x273   : > { %v1095_v5 = vadd.f32 %v2063_v47, %v1094_v1 }
 0x275   : > { %v1608_v44 = vpop.permute.xlu1 %1607 }
 0x276   : > { %1625 = vst.msk [vmem:[#allocation5 + $0x1c] sm:$0xf] %vm1617_vm12, %v1608_v44 }
 0x27a   : > { %v1097_v9 = vpop.f32.mrf.mxu1 }
 0x27b   : > { %v1098_v10 = vadd.f32 %v2063_v47, %v1097_v9 }
 0x27d   : > { %v2000_v45 = vld [vmem:[#allocation5 + $0x18] sm:$0xff] }
 0x27e   : > { %1985 = vmatmul.msk.bf16.gmra.mxu3 %vm1694_vm7, %v2000_v45 }
 0x282   : > { %v1099_v14 = vpop.f32.mrf.mxu1 }
 0x283   : > { %v1100_v16 = vadd.f32 %v2063_v47, %v1099_v14 }
 0x28a   : > { %v1102_v20 = vpop.f32.mrf.mxu1 }
 0x28b   : > { %v1103_v21 = vadd.f32 %v2063_v47, %v1102_v20 }
 0x292   : > { %v1104_v26 = vpop.f32.mrf.mxu1 }
 0x293   : > { %v1105_v28 = vadd.f32 %v2063_v47, %v1104_v26 }
 0x294   : > { %v1720_v49 = vpop.f32.mrf.mxu2 }
 0x295   : > { %v1721_v50 = vadd.f32 %v2064_v3, %v1720_v49 }
 0x297   : > { %v1740_v51 = vadd.f32 %v1721_v50, %v1088_v48 }
 0x299   : > { %v1748_v53 = vmax.f32 %v1740_v51, 0.0 }
 0x29b   : > { %1756 = vxpose.xlu2.b32.start [1/8] (short) (narrow) %v1748_v53, 8 }
 0x29c   : > { %v1722_v55 = vpop.f32.mrf.mxu2 }
 0x29d   : > { %v1723_v56 = vadd.f32 %v2064_v3, %v1722_v55 }
 0x29f   : > { %v1741_v57 = vadd.f32 %v1723_v56, %v1090_v54 }
 0x2a1   : > { %v1749_v58 = vmax.f32 %v1741_v57, 0.0 }
 0x2a3   : > { %1757 = vxpose.xlu2.b32.cont [2/8] (short) (narrow) %v1749_v58, 8 }
 0x2b1   : > { %v1725_v61 = vpop.f32.mrf.mxu3 }
 0x2b2   : > { %v1726_v62 = vadd.f32 %v2064_v3, %v1725_v61 }
 0x2b4   : > { %v1742_v63 = vadd.f32 %v1726_v62, %v1093_v60 }
 0x2b6   : > { %v1750_v4 = vmax.f32 %v1742_v63, 0.0 }
 0x2b8   : > { %1758 = vxpose.xlu2.b32.cont [3/8] (short) (narrow) %v1750_v4, 8 }
 0x2b9   : > { %v1727_v6 = vpop.f32.mrf.mxu3 }
 0x2ba   : > { %v1728_v7 = vadd.f32 %v2064_v3, %v1727_v6 }
 0x2bc   : > { %v1743_v0 = vadd.f32 %v1728_v7, %v1095_v5 }
 0x2be   : > { %v1751_v8 = vmax.f32 %v1743_v0, 0.0 }
 0x2c0   : > { %1759 = vxpose.xlu2.b32.cont [4/8] (short) (narrow) %v1751_v8, 8 }
 0x2e1   : > { %v1730_v11 = vpop.f32.mrf.mxu3 }
 0x2e2   : > { %v1731_v12 = vadd.f32 %v2064_v3, %v1730_v11 }
 0x2e4   : > { %v1744_v13 = vadd.f32 %v1731_v12, %v1098_v10 }
 0x2e6   : > { %v1752_v15 = vmax.f32 %v1744_v13, 0.0 }
 0x2e8   : > { %1760 = vxpose.xlu2.b32.cont [5/8] (short) (narrow) %v1752_v15, 8 }
 0x2e9   : > { %v1732_v17 = vpop.f32.mrf.mxu3 }
 0x2ea   : > { %v1733_v18 = vadd.f32 %v2064_v3, %v1732_v17 }
 0x2ec   : > { %v1745_v2 = vadd.f32 %v1733_v18, %v1100_v16 }
 0x2ee   : > { %v1753_v19 = vmax.f32 %v1745_v2, 0.0 }
 0x2f0   : > { %1761 = vxpose.xlu2.b32.cont [6/8] (short) (narrow) %v1753_v19, 8 }
 0x301   : > { %v1735_v22 = vpop.f32.mrf.mxu3 }
 0x302   : > { %v1736_v23 = vadd.f32 %v2064_v3, %v1735_v22 }
 0x304   : > { %v1746_v24 = vadd.f32 %v1736_v23, %v1103_v21 }
 0x306   : > { %v1754_v25 = vmax.f32 %v1746_v24, 0.0 }
 0x308   : > { %1762 = vxpose.xlu2.b32.cont [7/8] (short) (narrow) %v1754_v25, 8 }
 0x309   : > { %v1737_v27 = vpop.f32.mrf.mxu3 }
 0x30a   : > { %v1738_v29 = vadd.f32 %v2064_v3, %v1737_v27 }
 0x30c   : > { %v1747_v30 = vadd.f32 %v1738_v29, %v1105_v28 }
 0x30e   : > { %v1755_v31 = vmax.f32 %v1747_v30, 0.0 }
 0x310   : > { %1763 = vxpose.xlu2.b32.end [8/8] (short) (narrow) %v1755_v31, 8 }
 0x371   : > { %v1772_v32 = vpop.trf.xlu2 }
 0x372   : > { %1789 = vst.msk [vmem:[%s271_s16] sm:$0xff] %vm1788_vm0, %v1772_v32 }
 0x373   : > { %2092 = shalt.err (!%p2089_p3)
}
 0x374   : > { %2010 = dma.vmem_to_hbm [thread:$0]  (%p2220_p5), %s1804_s17, 128, %s1806_s8, %s1791_s18  }
 0x375 PF: > { %p2016_p4 = scmp.ge.s32.totalorder %s2127_s27, 2  ;;  %s1817_s15 = sand.u32 1, %s2115_s24  }
 0x376   : > { %s1818_s13 = scalar_lea.sflag [#allocation7], %s1817_s15 }
 0x377   : > { %p2013_p7 = pnand %p2016_p4, %p2224_p6 }
 0x379   : > { %p2014_p8 = pneg %p2013_p7 }
 0x37b   : > { %2110 = dma.done.wait (%p2014_p8), %s1818_s13, 128  }
 0x37c   : > { %2112 = vsyncadd (%p2014_p8), %s1818_s13, 4294967168  ;;  %p17_p9 = scmp.ge.s32.totalorder %s2207_s30, 4   ;;  %s2774_s24 = smov %s2119_s25 }
 0x37d   : > { %s2775_s25 = smov %s2123_s26  ;;  %s2776_s26 = smov %s2218_s10 }
 0x37e   : > { %s2777_s27 = smov %s2207_s30  ;;  %19 = sbr.rel (!%p17_p9) target bundleno = 3 (0x3), region = 158 }
 0x383   :  { %1824 = vsyncpa [#allocation7], 1 }
 0x384   :  { %1826 = vsyncpa [#allocation7 + $0x1], 1 }

</bundles_post_ra>
